<compile_context>
chip_gen: v7x
topology: tpu7x:2x2x1
jax: 0.10.0
libtpu: 0.0.40
codegen_flags: <defaults>
</compile_context>

<pallas_src>
import functools

import jax
import jax.numpy as jnp
from jax.experimental import pallas as pl
from jax.experimental.pallas import tpu as pltpu


def _memory_fwd_kernel(x_ref, cache_ref, w_ref, o_ref, *, mem_size, alpha):
    # x_ref:     [tc, d]      f32   token tile
    # cache_ref: [M_pad, d]   bf16  padded memory cache (VMEM-resident)
    # w_ref:     [2, d, d]    bf16  packed extractor weight halves (VMEM-resident)
    # o_ref:     [tc, d]      f32   output tile
    x = x_ref[...]                                                # keep f32 for exact residual

    # F.normalize(x, dim=-1)
    norm = jnp.sqrt(jnp.sum(x * x, axis=-1, keepdims=True))
    xn = (x / jnp.maximum(norm, 1e-12)).astype(jnp.bfloat16)

    cache = cache_ref[...]                                        # bf16 [M_pad, d]

    # score = normalize(x) @ cache.T   (contract last dims of both; f32 accumulation on MXU)
    score = jax.lax.dot_general(
        xn, cache,
        dimension_numbers=(((1,), (1,)), ((), ())),
        preferred_element_type=jnp.float32)                       # [tc, M_pad]

    # mask padded memory slots, softmax over the memory axis (dim=1)
    slot = jax.lax.broadcasted_iota(jnp.int32, score.shape, 1)
    score = jnp.where(slot < mem_size, score, -1e30)
    score = score - jnp.max(score, axis=-1, keepdims=True)
    p = jnp.exp(score)
    p = p / jnp.sum(p, axis=-1, keepdims=True)                    # exact divide (EUP/VPU idle)

    # fine_feature = softmax_score_cache @ cache
    fine = jnp.dot(p.astype(jnp.bfloat16), cache,
                   preferred_element_type=jnp.float32)            # [tc, d] f32

    # extractor: cat(x, fine) @ W.T == x @ W[:, :d].T + fine @ W[:, d:].T
    ext = jnp.dot(x.astype(jnp.bfloat16), w_ref[0],
                  preferred_element_type=jnp.float32)
    ext = ext + jnp.dot(fine.astype(jnp.bfloat16), w_ref[1],
                        preferred_element_type=jnp.float32)

    o_ref[...] = alpha * ext + x


def pack_memory_params(cache, w_extractor):
    """One-time packing of the module's parameters (hoisted out of the hot path).

    cache:       [M, d] f32   (text_fine_cache)
    w_extractor: [d, 2d] f32  (nn.Linear(2d, d, bias=False).weight)
    Returns (cache_p [M_pad, d] bf16, w_pack [2, d, d] bf16).
    """
    M, d = cache.shape
    assert w_extractor.shape == (d, 2 * d)
    M_pad = ((M + 127) // 128) * 128
    cache_p = jnp.zeros((M_pad, d), jnp.bfloat16).at[:M].set(cache.astype(jnp.bfloat16))
    w_pack = jnp.stack(
        [w_extractor[:, :d].T, w_extractor[:, d:].T]).astype(jnp.bfloat16)   # [2, d, d]
    return cache_p, w_pack


@functools.partial(jax.jit, static_argnames=("mem_size", "alpha", "tc"))
def memory_forward(text_token, cache_p, w_pack, *, mem_size, alpha=0.2, tc=128):
    """Eval-mode Memory.forward on pre-packed params. Returns (text_fine_feature, loss=0.0)."""
    C, d = text_token.shape
    M_pad, d2 = cache_p.shape
    assert d2 == d and w_pack.shape == (2, d, d)
    assert d % 128 == 0 and M_pad % 128 == 0

    # Token tile: feed the MXU with as many rows as the batch allows, but never over-pad a
    # tiny batch past the next sublane (8) multiple.
    tc = max(8, min(tc, ((C + 7) // 8) * 8))
    Cp = ((C + tc - 1) // tc) * tc
    x = text_token.astype(jnp.float32)
    if Cp != C:
        x = jnp.zeros((Cp, d), jnp.float32).at[:C].set(x)

    kernel = functools.partial(_memory_fwd_kernel, mem_size=mem_size, alpha=alpha)

    out = pl.pallas_call(
        kernel,
        out_shape=jax.ShapeDtypeStruct((Cp, d), jnp.float32),
        grid_spec=pltpu.PrefetchScalarGridSpec(
            num_scalar_prefetch=0,
            grid=(Cp // tc,),
            in_specs=[
                pl.BlockSpec((tc, d), lambda i: (i, 0)),          # tokens: tiled over i
                pl.BlockSpec((M_pad, d), lambda i: (0, 0)),       # cache: resident
                pl.BlockSpec((2, d, d), lambda i: (0, 0, 0)),     # packed weight: resident
            ],
            out_specs=pl.BlockSpec((tc, d), lambda i: (i, 0)),
        ),
        compiler_params=pltpu.CompilerParams(
            dimension_semantics=("parallel",),
            vmem_limit_bytes=64 * 1024 * 1024,
        ),
    )(x, cache_p, w_pack)

    text_fine_feature = out[:C]
    loss = 0.0  # eval-mode: self.training is False
    return text_fine_feature, loss


def _reference(text_token, cache, w, alpha):
    """Pure-JAX f32 reference of the PyTorch eval-mode forward."""
    xn = text_token / jnp.maximum(
        jnp.linalg.norm(text_token, axis=-1, keepdims=True), 1e-12)
    score = xn @ cache.T
    p = jax.nn.softmax(score, axis=1)
    fine = p @ cache
    ext = jnp.concatenate([text_token, fine], axis=-1) @ w.T
    return alpha * ext + text_token


if __name__ == "__main__":
    FEATURE_DIM = 768      # module default feature_dim
    MEMORY_SIZE = 25       # module default memory_size
    NUM_TOKENS = 8         # small batch of text tokens
    ALPHA = 0.2

    key = jax.random.PRNGKey(0)
    k_tok, k_cache, k_w = jax.random.split(key, 3)

    text_token = jax.random.normal(k_tok, (NUM_TOKENS, FEATURE_DIM), jnp.float32)
    # text_fine_cache: normalized random rows (as in Memory.__init__)
    cache = jax.random.uniform(k_cache, (MEMORY_SIZE, FEATURE_DIM), jnp.float32)
    cache = cache / jnp.linalg.norm(cache, axis=-1, keepdims=True)
    # extractor: nn.Linear(2d, d, bias=False).weight  -> [d, 2d]
    w = (1.0 / jnp.sqrt(2.0 * FEATURE_DIM)) * jax.random.normal(
        k_w, (FEATURE_DIM, 2 * FEATURE_DIM), jnp.float32)

    # One-time packing (would live in module init / param load, not in the hot path).
    cache_p, w_pack = pack_memory_params(cache, w)
    cache_p, w_pack = jax.block_until_ready((cache_p, w_pack))

    out, loss = memory_forward(text_token, cache_p, w_pack,
                               mem_size=MEMORY_SIZE, alpha=ALPHA)
    out = jax.block_until_ready(out)

    ref = _reference(text_token, cache, w, ALPHA)
    assert out.shape == (NUM_TOKENS, FEATURE_DIM)
    assert loss == 0.0
    err = float(jnp.max(jnp.abs(out - ref)))
    assert jnp.allclose(out, ref, atol=5e-3, rtol=5e-3), f"mismatch vs reference, max|diff|={err}"

    print("KERNEL_OK")
</pallas_src>

<mosaic_0001>
module attributes {stable_mosaic.version = 11 : i64} {
  func.func @_memory_fwd_kernel(%arg0: i32, %arg1: memref<8x768xf32, #tpu.memory_space<vmem>>, %arg2: memref<128x768xbf16, #tpu.memory_space<vmem>>, %arg3: memref<2x768x768xbf16, #tpu.memory_space<vmem>>, %arg4: memref<8x768xf32, #tpu.memory_space<vmem>>) attributes {dimension_semantics = [#tpu.dimension_semantics<parallel>], iteration_bounds = array<i64: 1>, scalar_prefetch = 0 : i64, scratch_operands = 0 : i64, tpu.core_type = #tpu.core_type<tc>, window_params = [{transform_indices = @transform_0, window_bounds = array<i64: 8, 768>}, {pipeline_mode = #tpu.pipeline_mode<synchronous>, transform_indices = @transform_1, window_bounds = array<i64: 128, 768>}, {pipeline_mode = #tpu.pipeline_mode<synchronous>, transform_indices = @transform_2, window_bounds = array<i64: 2, 768, 768>}, {transform_indices = @transform_3, window_bounds = array<i64: 8, 768>}]} {
    %c0 = arith.constant 0 : index
    %c0_0 = arith.constant 0 : index
    %0 = vector.load %arg1[%c0, %c0_0] : memref<8x768xf32, #tpu.memory_space<vmem>>, vector<8x768xf32>
    %1 = arith.mulf %0, %0 : vector<8x768xf32>
    %cst = arith.constant dense<0.000000e+00> : vector<8xf32>
    %2 = vector.multi_reduction <add>, %1, %cst [1] : vector<8x768xf32> to vector<8xf32>
    %3 = vector.shape_cast %2 : vector<8xf32> to vector<8x1xf32>
    %4 = math.sqrt %3 : vector<8x1xf32>
    %cst_1 = arith.constant 9.99999996E-13 : f32
    %5 = vector.broadcast %cst_1 : f32 to vector<8x1xf32>
    %6 = arith.maximumf %4, %5 : vector<8x1xf32>
    %7 = vector.broadcast %6 : vector<8x1xf32> to vector<8x768xf32>
    %8 = arith.divf %0, %7 : vector<8x768xf32>
    %9 = arith.truncf %8 : vector<8x768xf32> to vector<8x768xbf16>
    %c0_2 = arith.constant 0 : index
    %c0_3 = arith.constant 0 : index
    %10 = vector.load %arg2[%c0_2, %c0_3] : memref<128x768xbf16, #tpu.memory_space<vmem>>, vector<128x768xbf16>
    %cst_4 = arith.constant dense<0.000000e+00> : vector<8x128xf32>
    %11 = tpu.matmul %9, %10, %cst_4 {dimension_numbers = #tpu.dot_dimension_numbers<[1], [1], [0], [0], [0, 0, 1, 0], [], []>} : vector<8x768xbf16>, vector<128x768xbf16>, vector<8x128xf32> -> vector<8x128xf32>
    %12 = tpu.iota {dimensions = array<i32: 1>} : vector<8x128xi32>
    %c25_i32 = arith.constant 25 : i32
    %13 = vector.broadcast %c25_i32 : i32 to vector<8x128xi32>
    %14 = arith.cmpi slt, %12, %13 : vector<8x128xi32>
    %cst_5 = arith.constant -1.000000e+30 : f32
    %15 = vector.broadcast %cst_5 : f32 to vector<8x128xf32>
    %16 = arith.select %14, %11, %15 : vector<8x128xi1>, vector<8x128xf32>
    %cst_6 = arith.constant dense<0xFF800000> : vector<8xf32>
    %17 = vector.multi_reduction <maximumf>, %16, %cst_6 [1] : vector<8x128xf32> to vector<8xf32>
    %18 = vector.shape_cast %17 : vector<8xf32> to vector<8x1xf32>
    %19 = vector.broadcast %18 : vector<8x1xf32> to vector<8x128xf32>
    %20 = arith.subf %16, %19 : vector<8x128xf32>
    %21 = math.exp %20 : vector<8x128xf32>
    %cst_7 = arith.constant dense<0.000000e+00> : vector<8xf32>
    %22 = vector.multi_reduction <add>, %21, %cst_7 [1] : vector<8x128xf32> to vector<8xf32>
    %23 = vector.shape_cast %22 : vector<8xf32> to vector<8x1xf32>
    %24 = vector.broadcast %23 : vector<8x1xf32> to vector<8x128xf32>
    %25 = arith.divf %21, %24 : vector<8x128xf32>
    %26 = arith.truncf %25 : vector<8x128xf32> to vector<8x128xbf16>
    %cst_8 = arith.constant dense<0.000000e+00> : vector<8x768xf32>
    %27 = tpu.matmul %26, %10, %cst_8 {dimension_numbers = #tpu.dot_dimension_numbers<[1], [0], [0], [1], [0, 0, 1, 1], [], []>} : vector<8x128xbf16>, vector<128x768xbf16>, vector<8x768xf32> -> vector<8x768xf32>
    %28 = arith.truncf %0 : vector<8x768xf32> to vector<8x768xbf16>
    %c0_9 = arith.constant 0 : index
    %c0_10 = arith.constant 0 : index
    %c0_11 = arith.constant 0 : index
    %29 = vector.load %arg3[%c0_9, %c0_10, %c0_11] : memref<2x768x768xbf16, #tpu.memory_space<vmem>>, vector<1x768x768xbf16>
    %30 = vector.shape_cast %29 : vector<1x768x768xbf16> to vector<768x768xbf16>
    %cst_12 = arith.constant dense<0.000000e+00> : vector<8x768xf32>
    %31 = tpu.matmul %28, %30, %cst_12 {dimension_numbers = #tpu.dot_dimension_numbers<[1], [0], [0], [1], [0, 0, 1, 1], [], []>} : vector<8x768xbf16>, vector<768x768xbf16>, vector<8x768xf32> -> vector<8x768xf32>
    %32 = arith.truncf %27 : vector<8x768xf32> to vector<8x768xbf16>
    %c1 = arith.constant 1 : index
    %c0_13 = arith.constant 0 : index
    %c0_14 = arith.constant 0 : index
    %33 = vector.load %arg3[%c1, %c0_13, %c0_14] : memref<2x768x768xbf16, #tpu.memory_space<vmem>>, vector<1x768x768xbf16>
    %34 = vector.shape_cast %33 : vector<1x768x768xbf16> to vector<768x768xbf16>
    %cst_15 = arith.constant dense<0.000000e+00> : vector<8x768xf32>
    %35 = tpu.matmul %32, %34, %cst_15 {dimension_numbers = #tpu.dot_dimension_numbers<[1], [0], [0], [1], [0, 0, 1, 1], [], []>} : vector<8x768xbf16>, vector<768x768xbf16>, vector<8x768xf32> -> vector<8x768xf32>
    %36 = arith.addf %31, %35 : vector<8x768xf32>
    %cst_16 = arith.constant 2.000000e-01 : f32
    %37 = vector.broadcast %cst_16 : f32 to vector<8x768xf32>
    %38 = arith.mulf %37, %36 : vector<8x768xf32>
    %39 = arith.addf %38, %0 : vector<8x768xf32>
    %c0_17 = arith.constant 0 : index
    %c0_18 = arith.constant 0 : index
    %40 = vector.load %arg4[%c0_17, %c0_18] : memref<8x768xf32, #tpu.memory_space<vmem>>, vector<8x768xf32>
    tpu.vector_store %arg4[%c0_17, %c0_18], %39 {strides = array<i32>} : memref<8x768xf32, #tpu.memory_space<vmem>>, vector<8x768xf32>,
    return
  }
  func.func @transform_0(%arg0: i32) -> (i32, i32) {
    %c0_i32 = arith.constant 0 : i32
    %c0_i32_0 = arith.constant 0 : i32
    return %arg0, %c0_i32 : i32, i32
  }
  func.func @transform_1(%arg0: i32) -> (i32, i32) {
    %c0_i32 = arith.constant 0 : i32
    %c0_i32_0 = arith.constant 0 : i32
    %c0_i32_1 = arith.constant 0 : i32
    return %c0_i32, %c0_i32_0 : i32, i32
  }
  func.func @transform_2(%arg0: i32) -> (i32, i32, i32) {
    %c0_i32 = arith.constant 0 : i32
    %c0_i32_0 = arith.constant 0 : i32
    %c0_i32_1 = arith.constant 0 : i32
    %c0_i32_2 = arith.constant 0 : i32
    return %c0_i32, %c0_i32_0, %c0_i32_1 : i32, i32, i32
  }
  func.func @transform_3(%arg0: i32) -> (i32, i32) {
    %c0_i32 = arith.constant 0 : i32
    %c0_i32_0 = arith.constant 0 : i32
    return %arg0, %c0_i32 : i32, i32
  }
}

</mosaic_0001>

<bundles_post_ra>
// kernel: memory_forward.1
= control target key start
LH: loop header
LB: loop body
LE: loop exit
PB: predicated region body
PF: predicated region fallthrough
CT: control target
= control target key end

     0   :  { %8 = vsyncpa [#allocation3], 0  ;;  %s6940_s0 = inlined_call_operand.hbm [shape: f32[8,768], index: 0, kind: input, shape index: {}]   ;;  %s6941_s1 = inlined_call_operand.hbm [shape: bf16[128,768], index: 1, kind: input, shape index: {}]   ;;  %s6942_s2 = inlined_call_operand.hbm [shape: bf16[2,768,768], index: 2, kind: input, shape index: {}]   ;;  %s6943_s3 = inlined_call_operand.hbm [shape: f32[8,768], index: 3, kind: output, shape index: {}]  }
   0x1   :  { %9 = vsyncpa [#allocation6], 0 }
   0x2   :  { %10 = vsyncpa [#allocation4], 0  ;;  %s6629_s12 = smov [#allocation5]   ;;  %s6535_s16 = scalar_lea.hbm %s6941_s1, 6144 }
   0x3   :  { %s26_s13 = sshll.u32 %s6629_s12, 4  ;;  %p6536_p0 = scmp.ne.s32.totalorder %s6941_s1, %s6535_s16  ;;  %s27_s13 = int_to_ptr.vmem [resolvable:$true] %s26_s13 }
   0x4   :  { %p6539_p1 = scmp.lt.u32.totalorder %s6535_s16, %s6941_s1 }
   0x6   :  { %p6541_p2 = pnand %p6539_p1, %p6536_p0 }
   0x8   :  { %6544 = shalt.err (!%p6541_p2)
}
   0x9   :  { %s6545_s21 = scalar_lea.vmem %s27_s13, 6144  ;;  %p6550_p4 = scmp.lt.s32.totalorder %s27_s13, %s27_s13 }
   0xa   :  { %p6546_p3 = scmp.ne.s32.totalorder %s27_s13, %s6545_s21  ;;  %p6551_p5 = scmp.lt.s32.totalorder %s6545_s21, %s6545_s21 }
   0xc   :  { %p6552_p6 = por %p6551_p5, %p6550_p4 }
   0xe   :  { %p6553_p7 = pnand %p6552_p6, %p6546_p3 }
  0x10   :  { %6556 = shalt.err (!%p6553_p7)
}
  0x11   :  { %s6630_s22 = smov 384   ;;  %s6631_s23 = smov 24  }
  0x12   :  { %32 = dma.hbm_to_vmem [thread:$0]  %s6941_s1, 6144, %s27_s13, [#allocation6], %s6630_s22, %s6630_s22, %s6631_s23  }
  0x13   :  { %s6632_s26 = smov [#allocation2]   ;;  %s6633_s28 = smov [#allocation7]  }
  0x14   :  { %s17_s27 = sshll.u32 %s6632_s26, 4  ;;  %s38_s29 = sshll.u32 %s6633_s28, 4  ;;  %s18_s27 = int_to_ptr.vmem [resolvable:$true] %s17_s27  ;;  %s39_s29 = int_to_ptr.vmem [resolvable:$true] %s38_s29 }
  0x15   :  { %s6557_s5 = scalar_lea.hbm %s6940_s0, 768 }
  0x16   :  { %p6558_p8 = scmp.ne.s32.totalorder %s6940_s0, %s6557_s5  ;;  %p6561_p9 = scmp.lt.u32.totalorder %s6557_s5, %s6940_s0 }
  0x18   :  { %p6563_p10 = pnand %p6561_p9, %p6558_p8 }
  0x1a   :  { %6566 = shalt.err (!%p6563_p10)
}
  0x1b   :  { %s6567_s1 = scalar_lea.vmem %s18_s27, 768  ;;  %p6572_p12 = scmp.lt.s32.totalorder %s18_s27, %s18_s27 }
  0x1c   :  { %p6568_p11 = scmp.ne.s32.totalorder %s18_s27, %s6567_s1  ;;  %p6573_p13 = scmp.lt.s32.totalorder %s6567_s1, %s6567_s1 }
  0x1e   :  { %p6574_p0 = por %p6573_p13, %p6572_p12 }
  0x20   :  { %p6575_p1 = pnand %p6574_p0, %p6568_p11 }
  0x22   :  { %6578 = shalt.err (!%p6575_p1)
}
  0x23   :  { %20 = dma.hbm_to_vmem [thread:$0]  %s6940_s0, 768, %s18_s27, [#allocation3]  }
  0x24   :  { %s6579_s14 = scalar_lea.hbm %s6942_s2, 73728 }
  0x25   :  { %p6580_p2 = scmp.ne.s32.totalorder %s6942_s2, %s6579_s14  ;;  %p6583_p3 = scmp.lt.u32.totalorder %s6579_s14, %s6942_s2 }
  0x27   :  { %p6585_p4 = pnand %p6583_p3, %p6580_p2 }
  0x29   :  { %6588 = shalt.err (!%p6585_p4)
}
  0x2a   :  { %s6589_s19 = scalar_lea.vmem %s39_s29, 73728  ;;  %p6594_p6 = scmp.lt.s32.totalorder %s39_s29, %s39_s29 }
  0x2b   :  { %p6590_p5 = scmp.ne.s32.totalorder %s39_s29, %s6589_s19  ;;  %p6595_p7 = scmp.lt.s32.totalorder %s6589_s19, %s6589_s19 }
  0x2d   :  { %p6596_p8 = por %p6595_p7, %p6594_p6 }
  0x2f   :  { %p6597_p9 = pnand %p6596_p8, %p6590_p5 }
  0x31   :  { %6600 = shalt.err (!%p6597_p9)
}
  0x32   :  { %44 = dma.hbm_to_vmem [thread:$0]  %s6942_s2, 73728, %s39_s29, [#allocation6], %s6630_s22, %s6630_s22, %s6631_s23  }
  0x33   :  { %6623 = dma.done.wait [#allocation3], 768  }
  0x34   :  { %6624 = vsyncadd [#allocation3], 4294966528 }
  0x35   :  { %6625 = dma.done.wait [#allocation6], 79872  }
  0x36   :  { %6626 = vsyncadd [#allocation6], 4294887424  ;;  %v55_v0 = vld [vmem:[#allocation2] sm:$0xff]  ;;  %v56_v1 = vld [vmem:[#allocation2 + $0x8] sm:$0xff]  ;;  %s6635_s2 = smov [#allocation8]  }
  0x37   :  { %v57_v2 = vld [vmem:[#allocation2 + $0x10] sm:$0xff]  ;;  %v58_v3 = vld [vmem:[#allocation2 + $0x18] sm:$0xff]  ;;  %v59_v4 = vld [vmem:[#allocation2 + $0x20] sm:$0xff]  ;;  %v61_v5 = vmul.f32 %v55_v0, %v55_v0  ;;  %v62_v6 = vmul.f32 %v56_v1, %v56_v1  ;;  %s4871_s21 = sshll.u32 %s6635_s2, 4  ;;  %s4872_s21 = int_to_ptr.vmem [resolvable:$true] %s4871_s21 }
  0x38   :  { %v63_v7 = vmul.f32 %v57_v2, %v57_v2  ;;  %v5578_v8 = vld [vmem:[#allocation5 + $0x4] ss:$24 sps:$4 sm:$0xff]   ;;  %v64_v9 = vmul.f32 %v58_v3, %v58_v3  ;;  %v5580_v11 = vld [vmem:[#allocation5] ss:$24 sps:$4 sm:$0xff]   ;;  %v5581_v13 = vld [vmem:[#allocation5 + $0x34] ss:$24 sps:$4 sm:$0xff]   ;;  %v65_v14 = vmul.f32 %v59_v4, %v59_v4  ;;  %p6606_p11 = scmp.lt.s32.totalorder %s4872_s21, %s4872_s21 }
  0x39   :  { %v67_v10 = vadd.f32 %v62_v6, %v61_v5  ;;  %v60_v12 = vld [vmem:[#allocation2 + $0x28] sm:$0xff]  ;;  %383 = vmatprep.subr.bf16.mxu0 %v5578_v8  ;;  %517 = vmatprep.subr.bf16.mxu1 %v5578_v8  ;;  %v5583_v16 = vld [vmem:[#allocation5 + $0x30] ss:$24 sps:$4 sm:$0xff]   ;;  %v5587_v23 = vld [vmem:[#allocation5 + $0x94] ss:$24 sps:$4 sm:$0xff]   ;;  %s6601_s22 = scalar_lea.vmem %s4872_s21, 768 }
  0x3a   :  { %384 = vmatpush1.bf16.xpose.msra.mxu0 %v5580_v11  ;;  %518 = vmatpush1.bf16.msra.mxu1 %v5580_v11  ;;  %v66_v17 = vmul.f32 %v60_v12, %v60_v12  ;;  %v5584_v19 = vld [vmem:[#allocation5 + $0x64] ss:$24 sps:$4 sm:$0xff]   ;;  %v5586_v21 = vld [vmem:[#allocation5 + $0x60] ss:$24 sps:$4 sm:$0xff]   ;;  %v5589_v24 = vld [vmem:[#allocation5 + $0x90] ss:$24 sps:$4 sm:$0xff]   ;;  %p6602_p10 = scmp.ne.s32.totalorder %s4872_s21, %s6601_s22  ;;  %p6607_p12 = scmp.lt.s32.totalorder %s6601_s22, %s6601_s22 }
  0x3b   :  { %v68_v15 = vadd.f32 %v67_v10, %v63_v7  ;;  %385 = vmatprep.subr.bf16.mxu0 %v5581_v13  ;;  %519 = vmatprep.subr.bf16.mxu1 %v5581_v13  ;;  %v5590_v25 = vld [vmem:[#allocation5 + $0xc4] ss:$24 sps:$4 sm:$0xff]   ;;  %v5592_v26 = vld [vmem:[#allocation5 + $0xc0] ss:$24 sps:$4 sm:$0xff]   ;;  %v5593_v27 = vld [vmem:[#allocation5 + $0xf4] ss:$24 sps:$4 sm:$0xff]  }
  0x3c   :  { %v5595_v28 = vld [vmem:[#allocation5 + $0xf0] ss:$24 sps:$4 sm:$0xff]   ;;  %v5596_v29 = vld [vmem:[#allocation5 + $0x124] ss:$24 sps:$4 sm:$0xff]   ;;  %v5598_v30 = vld [vmem:[#allocation5 + $0x120] ss:$24 sps:$4 sm:$0xff]   ;;  %p6608_p13 = por %p6607_p12, %p6606_p11 }
  0x3d   :  { %v69_v18 = vadd.f32 %v68_v15, %v64_v9  ;;  %v5599_v31 = vld [vmem:[#allocation5 + $0x154] ss:$24 sps:$4 sm:$0xff]   ;;  %v5601_v32 = vld [vmem:[#allocation5 + $0x150] ss:$24 sps:$4 sm:$0xff]   ;;  %v6522_v42 = vld [vmem:[#allocation2 + $0x8] sm:$0xff] }
  0x3e   :  { %520 = vmatpush1.bf16.msra.mxu1 %v5583_v16  ;;  %v5604_v33 = vld [vmem:[#allocation5 + $0xc] ss:$24 sps:$4 sm:$0xff]   ;;  %v6701_v44 = vld [vmem:[#allocation5 + $0x8] ss:$24 sps:$4 sm:$0xff]   ;;  %v6523_v45 = vld [vmem:[#allocation2] sm:$0xff]  ;;  %p6609_p0 = pnand %p6608_p13, %p6602_p10 }
  0x3f   :  { %v70_v20 = vadd.f32 %v69_v18, %v65_v14  ;;  %521 = vmatprep.subr.bf16.mxu1 %v5584_v19  ;;  %v6524_v47 = vld [vmem:[#allocation2 + $0x18] sm:$0xff]  ;;  %v6705_v49 = vld [vmem:[#allocation5 + $0x3c] ss:$24 sps:$4 sm:$0xff]   ;;  %v6709_v53 = vld [vmem:[#allocation5 + $0x38] ss:$24 sps:$4 sm:$0xff]  }
  0x40   :  { %v6711_v54 = vld [vmem:[#allocation5 + $0x6c] ss:$24 sps:$4 sm:$0xff]   ;;  %v6715_v55 = vld [vmem:[#allocation5 + $0x68] ss:$24 sps:$4 sm:$0xff]   ;;  %v6717_v56 = vld [vmem:[#allocation5 + $0x9c] ss:$24 sps:$4 sm:$0xff]  }
  0x41   :  { %v71_v22 = vadd.f32 %v70_v20, %v66_v17  ;;  %v6721_v57 = vld [vmem:[#allocation5 + $0x98] ss:$24 sps:$4 sm:$0xff]   ;;  %v6723_v58 = vld [vmem:[#allocation5 + $0xcc] ss:$24 sps:$4 sm:$0xff]   ;;  %v6727_v59 = vld [vmem:[#allocation5 + $0xc8] ss:$24 sps:$4 sm:$0xff]  }
  0x42   :  { %386 = vmatpush1.bf16.xpose.msra.mxu0 %v5583_v16  ;;  %522 = vmatpush1.bf16.msra.mxu1 %v5586_v21  ;;  %v6729_v60 = vld [vmem:[#allocation5 + $0xfc] ss:$24 sps:$4 sm:$0xff]   ;;  %v6733_v61 = vld [vmem:[#allocation5 + $0xf8] ss:$24 sps:$4 sm:$0xff]   ;;  %v6735_v62 = vld [vmem:[#allocation5 + $0x12c] ss:$24 sps:$4 sm:$0xff]  }
  0x43   :  { %72 = vadd.xlane.f32.xlu0 %v71_v22  ;;  %387 = vmatprep.subr.bf16.mxu0 %v5584_v19  ;;  %v6739_v63 = vld [vmem:[#allocation5 + $0x128] ss:$24 sps:$4 sm:$0xff]   ;;  %v6741_v0 = vld [vmem:[#allocation5 + $0x15c] ss:$24 sps:$4 sm:$0xff]   ;;  %v6745_v1 = vld [vmem:[#allocation5 + $0x158] ss:$24 sps:$4 sm:$0xff]  }
  0x44   :  { %523 = vmatprep.subr.bf16.mxu1 %v5587_v23  ;;  %v6747_v2 = vld [vmem:[#allocation5 + $0x14] ss:$24 sps:$4 sm:$0xff]   ;;  %v6525_v3 = vld [vmem:[#allocation2 + $0x10] sm:$0xff]  ;;  %v6526_v5 = vld [vmem:[#allocation2 + $0x28] sm:$0xff] }
  0x45   :  { %v6753_v7 = vld [vmem:[#allocation5 + $0x10] ss:$24 sps:$4 sm:$0xff]   ;;  %v6755_v9 = vld [vmem:[#allocation5 + $0x44] ss:$24 sps:$4 sm:$0xff]   ;;  %v6759_v11 = vld [vmem:[#allocation5 + $0x40] ss:$24 sps:$4 sm:$0xff]  }
  0x46   :  { %524 = vmatpush1.bf16.msra.mxu1 %v5589_v24  ;;  %v6761_v12 = vld [vmem:[#allocation5 + $0x74] ss:$24 sps:$4 sm:$0xff]   ;;  %v6765_v13 = vld [vmem:[#allocation5 + $0x70] ss:$24 sps:$4 sm:$0xff]   ;;  %v6767_v14 = vld [vmem:[#allocation5 + $0xa4] ss:$24 sps:$4 sm:$0xff]  }
  0x47   :  { %525 = vmatprep.subr.bf16.mxu1 %v5590_v25  ;;  %v6771_v15 = vld [vmem:[#allocation5 + $0xa0] ss:$24 sps:$4 sm:$0xff]   ;;  %v6773_v16 = vld [vmem:[#allocation5 + $0xd4] ss:$24 sps:$4 sm:$0xff]   ;;  %v6777_v17 = vld [vmem:[#allocation5 + $0xd0] ss:$24 sps:$4 sm:$0xff]  }
  0x48   :  { %v6779_v18 = vld [vmem:[#allocation5 + $0x104] ss:$24 sps:$4 sm:$0xff]   ;;  %v6783_v19 = vld [vmem:[#allocation5 + $0x100] ss:$24 sps:$4 sm:$0xff]   ;;  %v6785_v20 = vld [vmem:[#allocation5 + $0x134] ss:$24 sps:$4 sm:$0xff]  }
  0x49   :  { %v6791_v22 = vld [vmem:[#allocation5 + $0x164] ss:$24 sps:$4 sm:$0xff]  }
  0x4a   :  { %388 = vmatpush1.bf16.xpose.msra.mxu0 %v5586_v21  ;;  %526 = vmatpush1.bf16.msra.mxu1 %v5592_v26  ;;  %v6789_v21 = vld [vmem:[#allocation5 + $0x130] ss:$24 sps:$4 sm:$0xff]  }
  0x4b   :  { %389 = vmatprep.subr.bf16.mxu0 %v5587_v23  ;;  %527 = vmatprep.subr.bf16.mxu1 %v5593_v27  ;;  %v6795_v23 = vld [vmem:[#allocation5 + $0x160] ss:$24 sps:$4 sm:$0xff]  }
  0x4e   :  { %528 = vmatpush1.bf16.msra.mxu1 %v5595_v28 }
  0x4f   :  { %529 = vmatprep.subr.bf16.mxu1 %v5596_v29 }
  0x52   :  { %390 = vmatpush1.bf16.xpose.msra.mxu0 %v5589_v24  ;;  %530 = vmatpush1.bf16.msra.mxu1 %v5598_v30  ;;  %v6527_v24 = vld [vmem:[#allocation2 + $0x20] sm:$0xff] }
  0x53   :  { %391 = vmatprep.subr.bf16.mxu0 %v5590_v25  ;;  %531 = vmatprep.subr.bf16.mxu1 %v5599_v31 }
  0x56   :  { %532 = vmatpush1.bf16.msra.mxu1 %v5601_v32 }
  0x57   :  { %558 = vmatprep.subr.bf16.mxu1 %v5604_v33 }
  0x5a   :  { %392 = vmatpush1.bf16.xpose.msra.mxu0 %v5592_v26 }
  0x5b   :  { %393 = vmatprep.subr.bf16.mxu0 %v5593_v27  ;;  %v503_v27 = vlaneseq }
  0x62   :  { %394 = vmatpush1.bf16.xpose.msra.mxu0 %v5595_v28  ;;  %v504_v28 = vand.u32 127, %v503_v27  ;;  %v5680_v27 = vld [vmem:[#allocation7 + $0xae0] ss:$24 sps:$4 sm:$0xff]  }
  0x63   :  { %395 = vmatprep.subr.bf16.mxu0 %v5596_v29 }
  0x64   :  { %vm505_vm2 = vcmp.lt.s32.totalorder %v504_v28, 25  ;;  %v5685_v28 = vld [vmem:[#allocation7 + $0xb14] ss:$24 sps:$4 sm:$0xff]  }
  0x6a   :  { %396 = vmatpush1.bf16.xpose.msra.mxu0 %v5598_v30 }
  0x6b   :  { %397 = vmatprep.subr.bf16.mxu0 %v5599_v31 }
  0x72   :  { %398 = vmatpush1.bf16.xpose.msra.mxu0 %v5601_v32 }
  0x73   :  { %423 = vmatprep.subr.bf16.mxu0 %v5604_v33 }
  0xd0   :  { %v73_v34 = vpop.xlane.xlu0 %72 }
  0xd1   :  { %6514 = vrsqrt.f32 %v73_v34  ;;  %vm76_vm0 = vcmp.eq.f32.partialorder %v73_v34, inf  ;;  %v79_v37 = vand.u32 2147483648, %v73_v34  ;;  %vm78_vm1 = vcmp.eq.f32.partialorder %v73_v34, 0.0 }
  0xdb   :  { %v6515_v35 = vpop.eup %6514 }
  0xdc   :  { %v75_v36 = vmul.f32 %v6515_v35, %v73_v34 }
  0xde   :  { %v77_v38 = vsel %vm76_vm0, %v73_v34, %v75_v36 }
  0xdf   :  { %v80_v39 = vsel %vm78_vm1, %v79_v37, %v77_v38  ;;  %v6634_v38 = vmov 0  }
  0xe0   :  { %v81_v40 = vmax.f32 %v80_v39, 1e-12  ;;  %549 = vmatprep.mubr.bf16.mxu1 %v6634_v38  ;;  %v5650_v39 = vld [vmem:[#allocation7 + $0x900] ss:$24 sps:$4 sm:$0xff]  }
  0xe2   :  { %6516 = vrcp.f32 %v81_v40  ;;  %v5652_v40 = vld [vmem:[#allocation7 + $0x904] ss:$24 sps:$4 sm:$0xff]  }
  0xec   :  { %v6698_v41 = vpop.eup %6516 }
  0xed   :  { %v84_v43 = vmul.f32 %v6522_v42, %v6698_v41  ;;  %v83_v46 = vmul.f32 %v6523_v45, %v6698_v41  ;;  %v86_v48 = vmul.f32 %v6524_v47, %v6698_v41  ;;  %v85_v4 = vmul.f32 %v6525_v3, %v6698_v41  ;;  %v5653_v42 = vld [vmem:[#allocation7 + $0x930] ss:$24 sps:$4 sm:$0xff]   ;;  %v5656_v45 = vld [vmem:[#allocation7 + $0x960] ss:$24 sps:$4 sm:$0xff]   ;;  %v5670_v3 = vld [vmem:[#allocation7 + $0xa24] ss:$24 sps:$4 sm:$0xff]  }
  0xee   :  { %v88_v6 = vmul.f32 %v6526_v5, %v6698_v41  ;;  %v87_v25 = vmul.f32 %v6527_v24, %v6698_v41  ;;  %v5655_v41 = vld [vmem:[#allocation7 + $0x934] ss:$24 sps:$4 sm:$0xff]   ;;  %v5659_v47 = vld [vmem:[#allocation7 + $0x990] ss:$24 sps:$4 sm:$0xff]  }
  0xef   :  { %v90_v50 = vpack.c.bf16 %v84_v43, %v84_v43  ;;  %v89_v51 = vpack.c.bf16 %v83_v46, %v83_v46  ;;  %v92_v52 = vpack.c.bf16 %v86_v48, %v86_v48  ;;  %v91_v8 = vpack.c.bf16 %v85_v4, %v85_v4  ;;  %v5658_v43 = vld [vmem:[#allocation7 + $0x964] ss:$24 sps:$4 sm:$0xff]   ;;  %v5661_v46 = vld [vmem:[#allocation7 + $0x994] ss:$24 sps:$4 sm:$0xff]   ;;  %v5668_v4 = vld [vmem:[#allocation7 + $0xa20] ss:$24 sps:$4 sm:$0xff]  }
  0xf0   :  { %v94_v10 = vpack.c.bf16 %v88_v6, %v88_v6  ;;  %v93_v26 = vpack.c.bf16 %v87_v25, %v87_v25  ;;  %v5664_v48 = vld [vmem:[#allocation7 + $0x9c4] ss:$24 sps:$4 sm:$0xff]   ;;  %v5673_v5 = vld [vmem:[#allocation7 + $0xa54] ss:$24 sps:$4 sm:$0xff]   ;;  %v5671_v6 = vld [vmem:[#allocation7 + $0xa50] ss:$24 sps:$4 sm:$0xff]  }
  0xf1   :  { %415 = vmatprep.mubr.bf16.mxu0 %v90_v50  ;;  %v5662_v50 = vld [vmem:[#allocation7 + $0x9c0] ss:$24 sps:$4 sm:$0xff]   ;;  %v5679_v24 = vld [vmem:[#allocation7 + $0xab4] ss:$24 sps:$4 sm:$0xff]   ;;  %v5677_v25 = vld [vmem:[#allocation7 + $0xab0] ss:$24 sps:$4 sm:$0xff]  }
  0xf2   :  { %416 = vmatmul.mubr.bf16.vlgmr.msra.gmra.mrb[0].mxu0 %v89_v51  ;;  %v5667_v51 = vld [vmem:[#allocation7 + $0x9f4] ss:$24 sps:$4 sm:$0xff]  }
  0xf3   :  { %424 = vmatpush1.bf16.xpose.msra.mxu0 %v6701_v44  ;;  %455 = vmatprep.mubr.bf16.mxu0 %v92_v52  ;;  %v5665_v52 = vld [vmem:[#allocation7 + $0x9f0] ss:$24 sps:$4 sm:$0xff]  }
  0xf4   :  { %425 = vmatprep.subr.bf16.mxu0 %v6705_v49 }
  0xfb   :  { %426 = vmatpush1.bf16.xpose.msra.mxu0 %v6709_v53 }
  0xfc   :  { %427 = vmatprep.subr.bf16.mxu0 %v6711_v54 }
 0x103   :  { %428 = vmatpush1.bf16.xpose.msra.mxu0 %v6715_v55 }
 0x104   :  { %429 = vmatprep.subr.bf16.mxu0 %v6717_v56 }
 0x10b   :  { %430 = vmatpush1.bf16.xpose.msra.mxu0 %v6721_v57 }
 0x10c   :  { %431 = vmatprep.subr.bf16.mxu0 %v6723_v58 }
 0x113   :  { %432 = vmatpush1.bf16.xpose.msra.mxu0 %v6727_v59 }
 0x114   :  { %433 = vmatprep.subr.bf16.mxu0 %v6729_v60 }
 0x11b   :  { %434 = vmatpush1.bf16.xpose.msra.mxu0 %v6733_v61 }
 0x11c   :  { %435 = vmatprep.subr.bf16.mxu0 %v6735_v62 }
 0x123   :  { %436 = vmatpush1.bf16.xpose.msra.mxu0 %v6739_v63 }
 0x124   :  { %437 = vmatprep.subr.bf16.mxu0 %v6741_v0 }
 0x12b   :  { %438 = vmatpush1.bf16.xpose.msra.mxu0 %v6745_v1 }
 0x12c   :  { %463 = vmatprep.subr.bf16.mxu0 %v6747_v2 }
 0x132   :  { %456 = vmatmul.mubr.bf16.vlgmr.msra.gmra.mrb[0].mxu0 %v91_v8  ;;  %v5676_v8 = vld [vmem:[#allocation7 + $0xa84] ss:$24 sps:$4 sm:$0xff]  }
 0x133   :  { %464 = vmatpush1.bf16.xpose.msra.mxu0 %v6753_v7  ;;  %495 = vmatprep.mubr.bf16.mxu0 %v94_v10  ;;  %v5674_v10 = vld [vmem:[#allocation7 + $0xa80] ss:$24 sps:$4 sm:$0xff]  }
 0x134   :  { %465 = vmatprep.subr.bf16.mxu0 %v6755_v9 }
 0x13b   :  { %466 = vmatpush1.bf16.xpose.msra.mxu0 %v6759_v11 }
 0x13c   :  { %467 = vmatprep.subr.bf16.mxu0 %v6761_v12 }
 0x143   :  { %468 = vmatpush1.bf16.xpose.msra.mxu0 %v6765_v13 }
 0x144   :  { %469 = vmatprep.subr.bf16.mxu0 %v6767_v14 }
 0x14b   :  { %470 = vmatpush1.bf16.xpose.msra.mxu0 %v6771_v15 }
 0x14c   :  { %471 = vmatprep.subr.bf16.mxu0 %v6773_v16 }
 0x153   :  { %472 = vmatpush1.bf16.xpose.msra.mxu0 %v6777_v17 }
 0x154   :  { %473 = vmatprep.subr.bf16.mxu0 %v6779_v18 }
 0x15b   :  { %474 = vmatpush1.bf16.xpose.msra.mxu0 %v6783_v19 }
 0x15c   :  { %475 = vmatprep.subr.bf16.mxu0 %v6785_v20 }
 0x163   :  { %476 = vmatpush1.bf16.xpose.msra.mxu0 %v6789_v21 }
 0x164   :  { %477 = vmatprep.subr.bf16.mxu0 %v6791_v22 }
 0x16b   :  { %478 = vmatpush1.bf16.xpose.msra.mxu0 %v6795_v23 }
 0x16c   :  { %2669 = vmatprep.subr.bf16.mxu0 %v5652_v40 }
 0x172   :  { %496 = vmatmul.mubr.bf16.vlgmr.msra.gmra.mrb[0].mxu0 %v93_v26  ;;  %v5682_v26 = vld [vmem:[#allocation7 + $0xae4] ss:$24 sps:$4 sm:$0xff]  }
 0x173   :  { %2670 = vmatpush1.bf16.msra.mxu0 %v5650_v39 }
 0x174   :  { %2671 = vmatprep.subr.bf16.mxu0 %v5655_v41 }
 0x177   :  { %2672 = vmatpush1.bf16.msra.mxu0 %v5653_v42  ;;  %v5790_v42 = vld [vmem:[#allocation7 + $0x11d4] ss:$24 sps:$4 sm:$0xff]  }
 0x178   :  { %2673 = vmatprep.subr.bf16.mxu0 %v5658_v43  ;;  %v5788_v43 = vld [vmem:[#allocation7 + $0x11d0] ss:$24 sps:$4 sm:$0xff]  }
 0x17b   :  { %2674 = vmatpush1.bf16.msra.mxu0 %v5656_v45  ;;  %v5796_v45 = vld [vmem:[#allocation7 + $0x914] ss:$24 sps:$4 sm:$0xff]  }
 0x17c   :  { %2675 = vmatprep.subr.bf16.mxu0 %v5661_v46 }
 0x17f   :  { %2676 = vmatpush1.bf16.msra.mxu0 %v5659_v47 }
 0x180   :  { %2677 = vmatprep.subr.bf16.mxu0 %v5664_v48 }
 0x183   :  { %2678 = vmatpush1.bf16.msra.mxu0 %v5662_v50 }
 0x184   :  { %2679 = vmatprep.subr.bf16.mxu0 %v5667_v51  ;;  %v5701_v51 = vld [vmem:[#allocation7 + $0xc00] ss:$24 sps:$4 sm:$0xff]  }
 0x187   :  { %2680 = vmatpush1.bf16.msra.mxu0 %v5665_v52 }
 0x188   :  { %2681 = vmatprep.subr.bf16.mxu0 %v5670_v3 }
 0x18b   :  { %2682 = vmatpush1.bf16.msra.mxu0 %v5668_v4  ;;  %v5709_v4 = vld [vmem:[#allocation7 + $0xc34] ss:$24 sps:$4 sm:$0xff]  }
 0x18c   :  { %2683 = vmatprep.subr.bf16.mxu0 %v5673_v5  ;;  %v5707_v5 = vld [vmem:[#allocation7 + $0xc30] ss:$24 sps:$4 sm:$0xff]  }
 0x18f   :  { %2684 = vmatpush1.bf16.msra.mxu0 %v5671_v6  ;;  %v5715_v6 = vld [vmem:[#allocation7 + $0xc64] ss:$24 sps:$4 sm:$0xff]  }
 0x190   :  { %2685 = vmatprep.subr.bf16.mxu0 %v5676_v8  ;;  %v5713_v8 = vld [vmem:[#allocation7 + $0xc60] ss:$24 sps:$4 sm:$0xff]  }
 0x193   :  { %2686 = vmatpush1.bf16.msra.mxu0 %v5674_v10  ;;  %v5721_v10 = vld [vmem:[#allocation7 + $0xc94] ss:$24 sps:$4 sm:$0xff]  }
 0x194   :  { %2687 = vmatprep.subr.bf16.mxu0 %v5679_v24  ;;  %v5719_v24 = vld [vmem:[#allocation7 + $0xc90] ss:$24 sps:$4 sm:$0xff]  }
 0x197   :  { %2688 = vmatpush1.bf16.msra.mxu0 %v5677_v25  ;;  %v5727_v25 = vld [vmem:[#allocation7 + $0xcc4] ss:$24 sps:$4 sm:$0xff]  }
 0x198   :  { %2689 = vmatprep.subr.bf16.mxu0 %v5682_v26  ;;  %v5725_v26 = vld [vmem:[#allocation7 + $0xcc0] ss:$24 sps:$4 sm:$0xff]  }
 0x19b   :  { %2690 = vmatpush1.bf16.msra.mxu0 %v5680_v27  ;;  %v5733_v27 = vld [vmem:[#allocation7 + $0xcf4] ss:$24 sps:$4 sm:$0xff]  }
 0x19c   :  { %2691 = vmatprep.subr.bf16.mxu0 %v5685_v28  ;;  %v5731_v28 = vld [vmem:[#allocation7 + $0xcf0] ss:$24 sps:$4 sm:$0xff]  }
 0x245   :  { %v497_v29 = vpop.f32.mrb[0].mxu0 }
 0x246   :  { %v499_v30 = vpop.f32.mrb[1].mxu0  ;;  %v506_v31 = vsel %vm505_vm2, %v497_v29, -1e+30  ;;  %v5683_v29 = vld [vmem:[#allocation7 + $0xb10] ss:$24 sps:$4 sm:$0xff]  }
 0x247   :  { %507 = vmax.xlane.f32.xlu0 %v506_v31  ;;  %v500_v32 = vpop.f32.mrb[2].mxu0  ;;  %v5688_v30 = vld [vmem:[#allocation7 + $0xb44] ss:$24 sps:$4 sm:$0xff]   ;;  %2692 = vmatpush1.bf16.msra.mxu0 %v5683_v29 }
 0x248   :  { %v501_v33 = vpop.f32.mrb[3].mxu0  ;;  %2693 = vmatprep.subr.bf16.mxu0 %v5688_v30  ;;  %v5739_v29 = vld [vmem:[#allocation7 + $0xd24] ss:$24 sps:$4 sm:$0xff]   ;;  %v5737_v30 = vld [vmem:[#allocation7 + $0xd20] ss:$24 sps:$4 sm:$0xff]  }
 0x249   :  { %v5691_v33 = vld [vmem:[#allocation7 + $0xb74] ss:$24 sps:$4 sm:$0xff]  }
 0x2d4   :  { %v508_v34 = vpop.xlane.xlu0 %507 }
 0x2d5   :  { %v509_v35 = vsub.f32 %v506_v31, %v508_v34  ;;  %v5686_v31 = vld [vmem:[#allocation7 + $0xb40] ss:$24 sps:$4 sm:$0xff]   ;;  %v5689_v34 = vld [vmem:[#allocation7 + $0xb70] ss:$24 sps:$4 sm:$0xff]  }
 0x2d6   :  { %2694 = vmatpush1.bf16.msra.mxu0 %v5686_v31  ;;  %v5745_v31 = vld [vmem:[#allocation7 + $0xd54] ss:$24 sps:$4 sm:$0xff]  }
 0x2d7   :  { %v510_v36 = vmul.f32 1.442695, %v509_v35  ;;  %2695 = vmatprep.subr.bf16.mxu0 %v5691_v33  ;;  %v5694_v35 = vld [vmem:[#allocation7 + $0xba4] ss:$24 sps:$4 sm:$0xff]  }
 0x2d8   :  { %v5751_v33 = vld [vmem:[#allocation7 + $0xd84] ss:$24 sps:$4 sm:$0xff]  }
 0x2d9   :  { %6518 = vpow2.f32 %v510_v36  ;;  %v5692_v36 = vld [vmem:[#allocation7 + $0xba0] ss:$24 sps:$4 sm:$0xff]  }
 0x2da   :  { %2696 = vmatpush1.bf16.msra.mxu0 %v5689_v34 }
 0x2db   :  { %2697 = vmatprep.subr.bf16.mxu0 %v5694_v35 }
 0x2de   :  { %2698 = vmatpush1.bf16.msra.mxu0 %v5692_v36 }
 0x2e3   :  { %v6799_v37 = vpop.eup %6518 }
 0x2e4   :  { %512 = vadd.xlane.f32.xlu1 %v6799_v37 }
 0x371   :  { %v513_v32 = vpop.xlane.xlu1 %512 }
 0x372   :  { %6520 = vrcp.f32 %v513_v32  ;;  %v5743_v32 = vld [vmem:[#allocation7 + $0xd50] ss:$24 sps:$4 sm:$0xff]  }
 0x37c   :  { %v6521_v39 = vpop.eup %6520 }
 0x37d   :  { %v515_v40 = vmul.f32 %v6521_v39, %v6799_v37  ;;  %v5782_v37 = vld [vmem:[#allocation7 + $0x11a0] ss:$24 sps:$4 sm:$0xff]  }
 0x37f   :  { %v516_v41 = vpack.c.bf16 %v515_v40, %v515_v40  ;;  %v5749_v40 = vld [vmem:[#allocation7 + $0xd80] ss:$24 sps:$4 sm:$0xff]  }
 0x381   :  { %550 = vmatmul.mubr.bf16.vlgmr.msra.gmra.mrb[0].mxu1 %v516_v41 }
 0x382   :  { %559 = vmatpush1.bf16.msra.mxu1 %v6701_v44  ;;  %590 = vmatprep.mubr.bf16.mxu1 %v6634_v38  ;;  %v5697_v44 = vld [vmem:[#allocation7 + $0xbd4] ss:$24 sps:$4 sm:$0xff]  }
 0x383   :  { %560 = vmatprep.subr.bf16.mxu1 %v6705_v49  ;;  %v5695_v49 = vld [vmem:[#allocation7 + $0xbd0] ss:$24 sps:$4 sm:$0xff]   ;;  %2699 = vmatprep.subr.bf16.mxu0 %v5697_v44  ;;  %v5757_v44 = vld [vmem:[#allocation7 + $0xdb4] ss:$24 sps:$4 sm:$0xff]  }
 0x384   :  { %2700 = vmatpush1.bf16.msra.mxu0 %v5695_v49  ;;  %v5755_v49 = vld [vmem:[#allocation7 + $0xdb0] ss:$24 sps:$4 sm:$0xff]  }
 0x386   :  { %561 = vmatpush1.bf16.msra.mxu1 %v6709_v53  ;;  %v5700_v53 = vld [vmem:[#allocation7 + $0xf04] ss:$24 sps:$4 sm:$0xff]  }
 0x387   :  { %562 = vmatprep.subr.bf16.mxu1 %v6711_v54  ;;  %v5698_v54 = vld [vmem:[#allocation7 + $0xf00] ss:$24 sps:$4 sm:$0xff]  }
 0x38a   :  { %563 = vmatpush1.bf16.msra.mxu1 %v6715_v55  ;;  %v5703_v55 = vld [vmem:[#allocation7 + $0xc04] ss:$24 sps:$4 sm:$0xff]  }
 0x38b   :  { %564 = vmatprep.subr.bf16.mxu1 %v6717_v56  ;;  %2710 = vmatprep.subr.bf16.mxu0 %v5703_v55  ;;  %v5704_v56 = vld [vmem:[#allocation7 + $0xf30] ss:$24 sps:$4 sm:$0xff]   ;;  %v5769_v55 = vld [vmem:[#allocation7 + $0xe14] ss:$24 sps:$4 sm:$0xff]  }
 0x38e   :  { %565 = vmatpush1.bf16.msra.mxu1 %v6721_v57  ;;  %v5706_v57 = vld [vmem:[#allocation7 + $0xf34] ss:$24 sps:$4 sm:$0xff]  }
 0x38f   :  { %566 = vmatprep.subr.bf16.mxu1 %v6723_v58  ;;  %v5710_v58 = vld [vmem:[#allocation7 + $0xf60] ss:$24 sps:$4 sm:$0xff]  }
 0x392   :  { %567 = vmatpush1.bf16.msra.mxu1 %v6727_v59  ;;  %v5712_v59 = vld [vmem:[#allocation7 + $0xf64] ss:$24 sps:$4 sm:$0xff]  }
 0x393   :  { %568 = vmatprep.subr.bf16.mxu1 %v6729_v60  ;;  %v5716_v60 = vld [vmem:[#allocation7 + $0xf90] ss:$24 sps:$4 sm:$0xff]  }
 0x396   :  { %569 = vmatpush1.bf16.msra.mxu1 %v6733_v61  ;;  %v5718_v61 = vld [vmem:[#allocation7 + $0xf94] ss:$24 sps:$4 sm:$0xff]  }
 0x397   :  { %570 = vmatprep.subr.bf16.mxu1 %v6735_v62  ;;  %v5722_v62 = vld [vmem:[#allocation7 + $0xfc0] ss:$24 sps:$4 sm:$0xff]  }
 0x39a   :  { %571 = vmatpush1.bf16.msra.mxu1 %v6739_v63  ;;  %v5724_v63 = vld [vmem:[#allocation7 + $0xfc4] ss:$24 sps:$4 sm:$0xff]  }
 0x39b   :  { %572 = vmatprep.subr.bf16.mxu1 %v6741_v0  ;;  %v5728_v0 = vld [vmem:[#allocation7 + $0xff0] ss:$24 sps:$4 sm:$0xff]  }
 0x39e   :  { %573 = vmatpush1.bf16.msra.mxu1 %v6745_v1  ;;  %v5730_v1 = vld [vmem:[#allocation7 + $0xff4] ss:$24 sps:$4 sm:$0xff]  }
 0x39f   :  { %599 = vmatprep.subr.bf16.mxu1 %v6747_v2  ;;  %v5734_v2 = vld [vmem:[#allocation7 + $0x1020] ss:$24 sps:$4 sm:$0xff]  }
 0x3a1   :  { %591 = vmatmul.mubr.bf16.vlgmr.msra.gmra.mrb[4].mxu1 %v516_v41 }
 0x3a2   :  { %600 = vmatpush1.bf16.msra.mxu1 %v6753_v7  ;;  %631 = vmatprep.mubr.bf16.mxu1 %v6634_v38  ;;  %v5736_v7 = vld [vmem:[#allocation7 + $0x1024] ss:$24 sps:$4 sm:$0xff]  }
 0x3a3   :  { %601 = vmatprep.subr.bf16.mxu1 %v6755_v9  ;;  %v5742_v9 = vld [vmem:[#allocation7 + $0x1054] ss:$24 sps:$4 sm:$0xff]   ;;  %v5784_v38 = vld [vmem:[#allocation7 + $0x11a4] ss:$24 sps:$4 sm:$0xff]  }
 0x3a6   :  { %602 = vmatpush1.bf16.msra.mxu1 %v6759_v11  ;;  %v5740_v11 = vld [vmem:[#allocation7 + $0x1050] ss:$24 sps:$4 sm:$0xff]  }
 0x3a7   :  { %603 = vmatprep.subr.bf16.mxu1 %v6761_v12  ;;  %v5748_v12 = vld [vmem:[#allocation7 + $0x1084] ss:$24 sps:$4 sm:$0xff]  }
 0x3aa   :  { %604 = vmatpush1.bf16.msra.mxu1 %v6765_v13  ;;  %v5746_v13 = vld [vmem:[#allocation7 + $0x1080] ss:$24 sps:$4 sm:$0xff]  }
 0x3ab   :  { %605 = vmatprep.subr.bf16.mxu1 %v6767_v14  ;;  %v5752_v14 = vld [vmem:[#allocation7 + $0x10b0] ss:$24 sps:$4 sm:$0xff]  }
 0x3ae   :  { %606 = vmatpush1.bf16.msra.mxu1 %v6771_v15  ;;  %v5754_v15 = vld [vmem:[#allocation7 + $0x10b4] ss:$24 sps:$4 sm:$0xff]  }
 0x3af   :  { %607 = vmatprep.subr.bf16.mxu1 %v6773_v16  ;;  %v5758_v16 = vld [vmem:[#allocation7 + $0x10e0] ss:$24 sps:$4 sm:$0xff]  }
 0x3b2   :  { %608 = vmatpush1.bf16.msra.mxu1 %v6777_v17  ;;  %v5760_v17 = vld [vmem:[#allocation7 + $0x10e4] ss:$24 sps:$4 sm:$0xff]  }
 0x3b3   :  { %609 = vmatprep.subr.bf16.mxu1 %v6779_v18  ;;  %v5764_v18 = vld [vmem:[#allocation7 + $0x1110] ss:$24 sps:$4 sm:$0xff]  }
 0x3b6   :  { %610 = vmatpush1.bf16.msra.mxu1 %v6783_v19  ;;  %v5766_v19 = vld [vmem:[#allocation7 + $0x1114] ss:$24 sps:$4 sm:$0xff]  }
 0x3b7   :  { %611 = vmatprep.subr.bf16.mxu1 %v6785_v20  ;;  %v5770_v20 = vld [vmem:[#allocation7 + $0x1140] ss:$24 sps:$4 sm:$0xff]  }
 0x3ba   :  { %612 = vmatpush1.bf16.msra.mxu1 %v6789_v21  ;;  %v5772_v21 = vld [vmem:[#allocation7 + $0x1144] ss:$24 sps:$4 sm:$0xff]  }
 0x3bb   :  { %613 = vmatprep.subr.bf16.mxu1 %v6791_v22  ;;  %v5776_v22 = vld [vmem:[#allocation7 + $0x1170] ss:$24 sps:$4 sm:$0xff]  }
 0x3be   :  { %614 = vmatpush1.bf16.msra.mxu1 %v6795_v23  ;;  %v5778_v23 = vld [vmem:[#allocation7 + $0x1174] ss:$24 sps:$4 sm:$0xff]  }
 0x3bf   :  { %2751 = vmatprep.subr.bf16.mxu1 %v5700_v53  ;;  %v5763_v53 = vld [vmem:[#allocation7 + $0xde4] ss:$24 sps:$4 sm:$0xff]  }
 0x3c1   :  { %632 = vmatmul.mubr.bf16.vlgmr.msra.gmra.mrb[8].mxu1 %v516_v41 }
 0x3c2   :  { %2752 = vmatpush1.bf16.msra.mxu1 %v5698_v54  ;;  %v5761_v54 = vld [vmem:[#allocation7 + $0xde0] ss:$24 sps:$4 sm:$0xff]  }
 0x3c3   :  { %2753 = vmatprep.subr.bf16.mxu1 %v5706_v57  ;;  %v5775_v57 = vld [vmem:[#allocation7 + $0xe44] ss:$24 sps:$4 sm:$0xff]  }
 0x3c6   :  { %2754 = vmatpush1.bf16.msra.mxu1 %v5704_v56  ;;  %v5767_v56 = vld [vmem:[#allocation7 + $0xe10] ss:$24 sps:$4 sm:$0xff]  }
 0x3c7   :  { %2755 = vmatprep.subr.bf16.mxu1 %v5712_v59  ;;  %v5781_v59 = vld [vmem:[#allocation7 + $0xe74] ss:$24 sps:$4 sm:$0xff]  }
 0x3ca   :  { %2756 = vmatpush1.bf16.msra.mxu1 %v5710_v58  ;;  %v5773_v58 = vld [vmem:[#allocation7 + $0xe40] ss:$24 sps:$4 sm:$0xff]  }
 0x3cb   :  { %2757 = vmatprep.subr.bf16.mxu1 %v5718_v61  ;;  %v5787_v61 = vld [vmem:[#allocation7 + $0xea4] ss:$24 sps:$4 sm:$0xff]  }
 0x3ce   :  { %2758 = vmatpush1.bf16.msra.mxu1 %v5716_v60  ;;  %v5779_v60 = vld [vmem:[#allocation7 + $0xe70] ss:$24 sps:$4 sm:$0xff]  }
 0x3cf   :  { %2759 = vmatprep.subr.bf16.mxu1 %v5724_v63  ;;  %v5793_v63 = vld [vmem:[#allocation7 + $0xed4] ss:$24 sps:$4 sm:$0xff]  }
 0x3d2   :  { %2760 = vmatpush1.bf16.msra.mxu1 %v5722_v62  ;;  %v5785_v62 = vld [vmem:[#allocation7 + $0xea0] ss:$24 sps:$4 sm:$0xff]  }
 0x3d3   :  { %2761 = vmatprep.subr.bf16.mxu1 %v5730_v1  ;;  %v5799_v1 = vld [vmem:[#allocation7 + $0x90c] ss:$24 sps:$4 sm:$0xff]  }
 0x3d6   :  { %2762 = vmatpush1.bf16.msra.mxu1 %v5728_v0  ;;  %v5791_v0 = vld [vmem:[#allocation7 + $0xed0] ss:$24 sps:$4 sm:$0xff]  }
 0x3d7   :  { %2763 = vmatprep.subr.bf16.mxu1 %v5736_v7 }
 0x3da   :  { %2764 = vmatpush1.bf16.msra.mxu1 %v5734_v2 }
 0x3db   :  { %2765 = vmatprep.subr.bf16.mxu1 %v5742_v9 }
 0x3de   :  { %2766 = vmatpush1.bf16.msra.mxu1 %v5740_v11 }
 0x3df   :  { %2767 = vmatprep.subr.bf16.mxu1 %v5748_v12  ;;  %v5794_v12 = vld [vmem:[#allocation7 + $0x910] ss:$24 sps:$4 sm:$0xff]  }
 0x3e2   :  { %2768 = vmatpush1.bf16.msra.mxu1 %v5746_v13  ;;  %v5797_v13 = vld [vmem:[#allocation7 + $0x908] ss:$24 sps:$4 sm:$0xff]  }
 0x3e3   :  { %2769 = vmatprep.subr.bf16.mxu1 %v5754_v15 }
 0x3e6   :  { %2770 = vmatpush1.bf16.msra.mxu1 %v5752_v14 }
 0x3e7   :  { %2771 = vmatprep.subr.bf16.mxu1 %v5760_v17  ;;  %v5802_v17 = vld [vmem:[#allocation7 + $0x944] ss:$24 sps:$4 sm:$0xff]  }
 0x3ea   :  { %2772 = vmatpush1.bf16.msra.mxu1 %v5758_v16 }
 0x3eb   :  { %2773 = vmatprep.subr.bf16.mxu1 %v5766_v19  ;;  %v5800_v19 = vld [vmem:[#allocation7 + $0x940] ss:$24 sps:$4 sm:$0xff]  }
 0x3ee   :  { %2774 = vmatpush1.bf16.msra.mxu1 %v5764_v18  ;;  %v5805_v18 = vld [vmem:[#allocation7 + $0x93c] ss:$24 sps:$4 sm:$0xff]  }
 0x3ef   :  { %2775 = vmatprep.subr.bf16.mxu1 %v5772_v21  ;;  %v5808_v21 = vld [vmem:[#allocation7 + $0x974] ss:$24 sps:$4 sm:$0xff]  }
 0x3f2   :  { %2776 = vmatpush1.bf16.msra.mxu1 %v5770_v20  ;;  %v5803_v20 = vld [vmem:[#allocation7 + $0x938] ss:$24 sps:$4 sm:$0xff]  }
 0x3f3   :  { %2777 = vmatprep.subr.bf16.mxu1 %v5778_v23  ;;  %v5806_v23 = vld [vmem:[#allocation7 + $0x970] ss:$24 sps:$4 sm:$0xff]  }
 0x3f6   :  { %2778 = vmatpush1.bf16.msra.mxu1 %v5776_v22  ;;  %v5811_v22 = vld [vmem:[#allocation7 + $0x96c] ss:$24 sps:$4 sm:$0xff]  }
 0x3f7   :  { %2779 = vmatprep.subr.bf16.mxu1 %v5784_v38  ;;  %v5814_v38 = vld [vmem:[#allocation7 + $0x9a4] ss:$24 sps:$4 sm:$0xff]  }
 0x3fa   :  { %2780 = vmatpush1.bf16.msra.mxu1 %v5782_v37  ;;  %v5809_v37 = vld [vmem:[#allocation7 + $0x968] ss:$24 sps:$4 sm:$0xff]  }
 0x3fb   :  { %2781 = vmatprep.subr.bf16.mxu1 %v5790_v42  ;;  %v5817_v42 = vld [vmem:[#allocation7 + $0x99c] ss:$24 sps:$4 sm:$0xff]  }
 0x3fe   :  { %2782 = vmatpush1.bf16.msra.mxu1 %v5788_v43  ;;  %v5812_v43 = vld [vmem:[#allocation7 + $0x9a0] ss:$24 sps:$4 sm:$0xff]  }
 0x3ff   :  { %2915 = vmatprep.subr.bf16.mxu1 %v5796_v45  ;;  %v5815_v45 = vld [vmem:[#allocation7 + $0x998] ss:$24 sps:$4 sm:$0xff]  }
 0x454   :  { %v551_v46 = vpop.f32.mrb[0].mxu1 }
 0x455   :  { %v553_v47 = vpop.f32.mrb[1].mxu1  ;;  %v6839_v52 = vpack.c.bf16 %v551_v46, %v551_v46  ;;  %v5820_v46 = vld [vmem:[#allocation7 + $0x9d4] ss:$24 sps:$4 sm:$0xff]  }
 0x456   :  { %v6837_v48 = vpack.c.bf16 %v553_v47, %v553_v47  ;;  %v555_v50 = vpop.f32.mrb[2].mxu1  ;;  %v5823_v47 = vld [vmem:[#allocation7 + $0x9cc] ss:$24 sps:$4 sm:$0xff]  }
 0x457   :  { %v556_v3 = vpop.f32.mrb[3].mxu1  ;;  %v5821_v50 = vld [vmem:[#allocation7 + $0x9c8] ss:$24 sps:$4 sm:$0xff]  }
 0x458   :  { %2701 = vmatprep.mubr.bf16.mxu0 %v6837_v48  ;;  %v5829_v3 = vld [vmem:[#allocation7 + $0x9fc] ss:$24 sps:$4 sm:$0xff]  }
 0x459   :  { %2702 = vmatmul.mubr.bf16.vlgmr.msra.gmra.mrb[4].mxu0 %v6839_v52 }
 0x45a   :  { %2711 = vmatpush1.bf16.msra.mxu0 %v5701_v51  ;;  %v5826_v51 = vld [vmem:[#allocation7 + $0xa04] ss:$24 sps:$4 sm:$0xff]  }
 0x45b   :  { %2712 = vmatprep.subr.bf16.mxu0 %v5709_v4  ;;  %v5824_v4 = vld [vmem:[#allocation7 + $0xa00] ss:$24 sps:$4 sm:$0xff]  }
 0x45e   :  { %2713 = vmatpush1.bf16.msra.mxu0 %v5707_v5  ;;  %v5827_v5 = vld [vmem:[#allocation7 + $0x9f8] ss:$24 sps:$4 sm:$0xff]  }
 0x45f   :  { %2714 = vmatprep.subr.bf16.mxu0 %v5715_v6  ;;  %v5832_v6 = vld [vmem:[#allocation7 + $0xa34] ss:$24 sps:$4 sm:$0xff]  }
 0x462   :  { %2715 = vmatpush1.bf16.msra.mxu0 %v5713_v8  ;;  %v5835_v8 = vld [vmem:[#allocation7 + $0xa2c] ss:$24 sps:$4 sm:$0xff]  }
 0x463   :  { %2716 = vmatprep.subr.bf16.mxu0 %v5721_v10  ;;  %v5830_v10 = vld [vmem:[#allocation7 + $0xa30] ss:$24 sps:$4 sm:$0xff]  }
 0x466   :  { %2717 = vmatpush1.bf16.msra.mxu0 %v5719_v24  ;;  %v5833_v24 = vld [vmem:[#allocation7 + $0xa28] ss:$24 sps:$4 sm:$0xff]  }
 0x467   :  { %2718 = vmatprep.subr.bf16.mxu0 %v5727_v25  ;;  %v5838_v25 = vld [vmem:[#allocation7 + $0xa64] ss:$24 sps:$4 sm:$0xff]  }
 0x46a   :  { %2719 = vmatpush1.bf16.msra.mxu0 %v5725_v26  ;;  %v5841_v26 = vld [vmem:[#allocation7 + $0xa5c] ss:$24 sps:$4 sm:$0xff]  }
 0x46b   :  { %2720 = vmatprep.subr.bf16.mxu0 %v5733_v27  ;;  %v5836_v27 = vld [vmem:[#allocation7 + $0xa60] ss:$24 sps:$4 sm:$0xff]  }
 0x46e   :  { %2721 = vmatpush1.bf16.msra.mxu0 %v5731_v28  ;;  %v5839_v28 = vld [vmem:[#allocation7 + $0xa58] ss:$24 sps:$4 sm:$0xff]  }
 0x46f   :  { %2722 = vmatprep.subr.bf16.mxu0 %v5739_v29  ;;  %v5844_v29 = vld [vmem:[#allocation7 + $0xa94] ss:$24 sps:$4 sm:$0xff]  }
 0x472   :  { %2723 = vmatpush1.bf16.msra.mxu0 %v5737_v30  ;;  %v5847_v30 = vld [vmem:[#allocation7 + $0xa8c] ss:$24 sps:$4 sm:$0xff]  }
 0x473   :  { %2724 = vmatprep.subr.bf16.mxu0 %v5745_v31  ;;  %v5842_v31 = vld [vmem:[#allocation7 + $0xa90] ss:$24 sps:$4 sm:$0xff]  }
 0x474   :  { %v592_v34 = vpop.f32.mrb[4].mxu1 }
 0x475   :  { %v594_v35 = vpop.f32.mrb[5].mxu1  ;;  %v6848_v14 = vpack.c.bf16 %v592_v34, %v592_v34  ;;  %v5853_v34 = vld [vmem:[#allocation7 + $0xabc] ss:$24 sps:$4 sm:$0xff]  }
 0x476   :  { %v6843_v36 = vpack.c.bf16 %v594_v35, %v594_v35  ;;  %v596_v39 = vpop.f32.mrb[6].mxu1  ;;  %2725 = vmatpush1.bf16.msra.mxu0 %v5743_v32  ;;  %v5845_v32 = vld [vmem:[#allocation7 + $0xa88] ss:$24 sps:$4 sm:$0xff]  }
 0x477   :  { %v597_v41 = vpop.f32.mrb[7].mxu1  ;;  %2726 = vmatprep.subr.bf16.mxu0 %v5751_v33  ;;  %v5850_v33 = vld [vmem:[#allocation7 + $0xac4] ss:$24 sps:$4 sm:$0xff]   ;;  %v5848_v35 = vld [vmem:[#allocation7 + $0xac0] ss:$24 sps:$4 sm:$0xff]  }
 0x478   :  { %2742 = vmatprep.mubr.bf16.mxu0 %v6843_v36  ;;  %v5851_v39 = vld [vmem:[#allocation7 + $0xab8] ss:$24 sps:$4 sm:$0xff]   ;;  %v5859_v41 = vld [vmem:[#allocation7 + $0xaec] ss:$24 sps:$4 sm:$0xff]  }
 0x47a   :  { %2727 = vmatpush1.bf16.msra.mxu0 %v5749_v40  ;;  %v5856_v40 = vld [vmem:[#allocation7 + $0xaf4] ss:$24 sps:$4 sm:$0xff]  }
 0x47b   :  { %2728 = vmatprep.subr.bf16.mxu0 %v5757_v44  ;;  %v5854_v44 = vld [vmem:[#allocation7 + $0xaf0] ss:$24 sps:$4 sm:$0xff]  }
 0x47e   :  { %2729 = vmatpush1.bf16.msra.mxu0 %v5755_v49  ;;  %v5857_v49 = vld [vmem:[#allocation7 + $0xae8] ss:$24 sps:$4 sm:$0xff]  }
 0x47f   :  { %2730 = vmatprep.subr.bf16.mxu0 %v5763_v53  ;;  %v5862_v53 = vld [vmem:[#allocation7 + $0xb24] ss:$24 sps:$4 sm:$0xff]  }
 0x482   :  { %2731 = vmatpush1.bf16.msra.mxu0 %v5761_v54  ;;  %v5865_v54 = vld [vmem:[#allocation7 + $0xb1c] ss:$24 sps:$4 sm:$0xff]  }
 0x483   :  { %2732 = vmatprep.subr.bf16.mxu0 %v5769_v55  ;;  %v5860_v55 = vld [vmem:[#allocation7 + $0xb20] ss:$24 sps:$4 sm:$0xff]  }
 0x486   :  { %2733 = vmatpush1.bf16.msra.mxu0 %v5767_v56  ;;  %v5863_v56 = vld [vmem:[#allocation7 + $0xb18] ss:$24 sps:$4 sm:$0xff]  }
 0x487   :  { %2734 = vmatprep.subr.bf16.mxu0 %v5775_v57  ;;  %v5868_v57 = vld [vmem:[#allocation7 + $0xb54] ss:$24 sps:$4 sm:$0xff]  }
 0x48a   :  { %2735 = vmatpush1.bf16.msra.mxu0 %v5773_v58  ;;  %v5871_v58 = vld [vmem:[#allocation7 + $0xb4c] ss:$24 sps:$4 sm:$0xff]  }
 0x48b   :  { %2736 = vmatprep.subr.bf16.mxu0 %v5781_v59  ;;  %v5866_v59 = vld [vmem:[#allocation7 + $0xb50] ss:$24 sps:$4 sm:$0xff]  }
 0x48e   :  { %2737 = vmatpush1.bf16.msra.mxu0 %v5779_v60  ;;  %v5869_v60 = vld [vmem:[#allocation7 + $0xb48] ss:$24 sps:$4 sm:$0xff]  }
 0x48f   :  { %2738 = vmatprep.subr.bf16.mxu0 %v5787_v61  ;;  %v5874_v61 = vld [vmem:[#allocation7 + $0xb84] ss:$24 sps:$4 sm:$0xff]  }
 0x492   :  { %2739 = vmatpush1.bf16.msra.mxu0 %v5785_v62  ;;  %v5877_v62 = vld [vmem:[#allocation7 + $0xb7c] ss:$24 sps:$4 sm:$0xff]  }
 0x493   :  { %2740 = vmatprep.subr.bf16.mxu0 %v5793_v63  ;;  %v5872_v63 = vld [vmem:[#allocation7 + $0xb80] ss:$24 sps:$4 sm:$0xff]  }
 0x494   :  { %v633_v2 = vpop.f32.mrb[8].mxu1 }
 0x495   :  { %v635_v7 = vpop.f32.mrb[9].mxu1  ;;  %v6850_v15 = vpack.c.bf16 %v633_v2, %v633_v2  ;;  %v5883_v2 = vld [vmem:[#allocation7 + $0xbac] ss:$24 sps:$4 sm:$0xff]  }
 0x496   :  { %v6846_v9 = vpack.c.bf16 %v635_v7, %v635_v7  ;;  %v637_v11 = vpop.f32.mrb[10].mxu1  ;;  %2741 = vmatpush1.bf16.msra.mxu0 %v5791_v0  ;;  %v5875_v0 = vld [vmem:[#allocation7 + $0xb78] ss:$24 sps:$4 sm:$0xff]  }
 0x497   :  { %v638_v16 = vpop.f32.mrb[11].mxu1  ;;  %2792 = vmatprep.subr.bf16.mxu0 %v5799_v1  ;;  %v5880_v1 = vld [vmem:[#allocation7 + $0xbb4] ss:$24 sps:$4 sm:$0xff]   ;;  %v5878_v7 = vld [vmem:[#allocation7 + $0xbb0] ss:$24 sps:$4 sm:$0xff]  }
 0x498   :  { %2783 = vmatprep.mubr.bf16.mxu1 %v6846_v9  ;;  %v5881_v11 = vld [vmem:[#allocation7 + $0xba8] ss:$24 sps:$4 sm:$0xff]  }
 0x499   :  { %2743 = vmatmul.mubr.bf16.vlgmr.msra.gmra.mrb[4].mxu0 %v6848_v14  ;;  %2784 = vmatmul.mubr.bf16.vlgmr.msra.gmra.mrb[12].mxu1 %v6850_v15  ;;  %v5884_v16 = vld [vmem:[#allocation7 + $0xbe0] ss:$24 sps:$4 sm:$0xff]  }
 0x49a   :  { %2916 = vmatpush1.bf16.msra.mxu1 %v5794_v12  ;;  %2793 = vmatpush1.bf16.msra.mxu0 %v5797_v13  ;;  %v5886_v12 = vld [vmem:[#allocation7 + $0xbe4] ss:$24 sps:$4 sm:$0xff]  }
 0x49b   :  { %2824 = vmatprep.mubr.bf16.mxu0 %v6837_v48  ;;  %2947 = vmatprep.mubr.bf16.mxu1 %v6837_v48  ;;  %v5818_v48 = vld [vmem:[#allocation7 + $0x9d0] ss:$24 sps:$4 sm:$0xff]   ;;  %v5889_v13 = vld [vmem:[#allocation7 + $0xbdc] ss:$24 sps:$4 sm:$0xff]  }
 0x49c   :  { %2917 = vmatprep.subr.bf16.mxu1 %v5802_v17  ;;  %2794 = vmatprep.subr.bf16.mxu0 %v5805_v18  ;;  %v5887_v17 = vld [vmem:[#allocation7 + $0xbd8] ss:$24 sps:$4 sm:$0xff]   ;;  %v5892_v18 = vld [vmem:[#allocation7 + $0xc14] ss:$24 sps:$4 sm:$0xff]  }
 0x49e   :  { %2918 = vmatpush1.bf16.msra.mxu1 %v5800_v19  ;;  %2795 = vmatpush1.bf16.msra.mxu0 %v5803_v20  ;;  %v5895_v19 = vld [vmem:[#allocation7 + $0xc0c] ss:$24 sps:$4 sm:$0xff]   ;;  %v5890_v20 = vld [vmem:[#allocation7 + $0xc10] ss:$24 sps:$4 sm:$0xff]  }
 0x49f   :  { %2919 = vmatprep.subr.bf16.mxu1 %v5808_v21  ;;  %2796 = vmatprep.subr.bf16.mxu0 %v5811_v22  ;;  %v5893_v21 = vld [vmem:[#allocation7 + $0xc08] ss:$24 sps:$4 sm:$0xff]   ;;  %v5898_v22 = vld [vmem:[#allocation7 + $0xc44] ss:$24 sps:$4 sm:$0xff]  }
 0x4a2   :  { %2920 = vmatpush1.bf16.msra.mxu1 %v5806_v23  ;;  %2797 = vmatpush1.bf16.msra.mxu0 %v5809_v37  ;;  %v5901_v23 = vld [vmem:[#allocation7 + $0xc3c] ss:$24 sps:$4 sm:$0xff]   ;;  %v5896_v37 = vld [vmem:[#allocation7 + $0xc40] ss:$24 sps:$4 sm:$0xff]  }
 0x4a3   :  { %2921 = vmatprep.subr.bf16.mxu1 %v5814_v38  ;;  %2798 = vmatprep.subr.bf16.mxu0 %v5817_v42  ;;  %v5899_v38 = vld [vmem:[#allocation7 + $0xc38] ss:$24 sps:$4 sm:$0xff]   ;;  %v5904_v42 = vld [vmem:[#allocation7 + $0xc74] ss:$24 sps:$4 sm:$0xff]  }
 0x4a6   :  { %2922 = vmatpush1.bf16.msra.mxu1 %v5812_v43  ;;  %2799 = vmatpush1.bf16.msra.mxu0 %v5815_v45  ;;  %v5907_v43 = vld [vmem:[#allocation7 + $0xc6c] ss:$24 sps:$4 sm:$0xff]   ;;  %v5902_v45 = vld [vmem:[#allocation7 + $0xc70] ss:$24 sps:$4 sm:$0xff]  }
 0x4a7   :  { %2923 = vmatprep.subr.bf16.mxu1 %v5820_v46  ;;  %2800 = vmatprep.subr.bf16.mxu0 %v5823_v47  ;;  %v5905_v46 = vld [vmem:[#allocation7 + $0xc68] ss:$24 sps:$4 sm:$0xff]   ;;  %v5910_v47 = vld [vmem:[#allocation7 + $0xca4] ss:$24 sps:$4 sm:$0xff]  }
 0x4aa   :  { %2924 = vmatpush1.bf16.msra.mxu1 %v5818_v48  ;;  %2801 = vmatpush1.bf16.msra.mxu0 %v5821_v50  ;;  %v5908_v48 = vld [vmem:[#allocation7 + $0xca0] ss:$24 sps:$4 sm:$0xff]  }
 0x4ab   :  { %2925 = vmatprep.subr.bf16.mxu1 %v5826_v51  ;;  %2802 = vmatprep.subr.bf16.mxu0 %v5829_v3  ;;  %v5911_v50 = vld [vmem:[#allocation7 + $0xc98] ss:$24 sps:$4 sm:$0xff]   ;;  %v5916_v51 = vld [vmem:[#allocation7 + $0xcd4] ss:$24 sps:$4 sm:$0xff]  }
 0x4ac   :  { %v5914_v3 = vld [vmem:[#allocation7 + $0xcd0] ss:$24 sps:$4 sm:$0xff]  }
 0x4ae   :  { %2926 = vmatpush1.bf16.msra.mxu1 %v5824_v4  ;;  %2803 = vmatpush1.bf16.msra.mxu0 %v5827_v5  ;;  %v5917_v4 = vld [vmem:[#allocation7 + $0xcc8] ss:$24 sps:$4 sm:$0xff]   ;;  %v5922_v5 = vld [vmem:[#allocation7 + $0xd04] ss:$24 sps:$4 sm:$0xff]  }
 0x4af   :  { %2927 = vmatprep.subr.bf16.mxu1 %v5832_v6  ;;  %2804 = vmatprep.subr.bf16.mxu0 %v5835_v8  ;;  %v5925_v6 = vld [vmem:[#allocation7 + $0xcfc] ss:$24 sps:$4 sm:$0xff]   ;;  %v5920_v8 = vld [vmem:[#allocation7 + $0xd00] ss:$24 sps:$4 sm:$0xff]  }
 0x4b2   :  { %2928 = vmatpush1.bf16.msra.mxu1 %v5830_v10  ;;  %2805 = vmatpush1.bf16.msra.mxu0 %v5833_v24  ;;  %v5923_v10 = vld [vmem:[#allocation7 + $0xcf8] ss:$24 sps:$4 sm:$0xff]   ;;  %v5928_v24 = vld [vmem:[#allocation7 + $0xd34] ss:$24 sps:$4 sm:$0xff]  }
 0x4b3   :  { %2929 = vmatprep.subr.bf16.mxu1 %v5838_v25  ;;  %2806 = vmatprep.subr.bf16.mxu0 %v5841_v26  ;;  %v5931_v25 = vld [vmem:[#allocation7 + $0xd2c] ss:$24 sps:$4 sm:$0xff]   ;;  %v5926_v26 = vld [vmem:[#allocation7 + $0xd30] ss:$24 sps:$4 sm:$0xff]  }
 0x4b6   :  { %2930 = vmatpush1.bf16.msra.mxu1 %v5836_v27  ;;  %2807 = vmatpush1.bf16.msra.mxu0 %v5839_v28  ;;  %v5929_v27 = vld [vmem:[#allocation7 + $0xd28] ss:$24 sps:$4 sm:$0xff]   ;;  %v5934_v28 = vld [vmem:[#allocation7 + $0xd64] ss:$24 sps:$4 sm:$0xff]  }
 0x4b7   :  { %2931 = vmatprep.subr.bf16.mxu1 %v5844_v29  ;;  %2808 = vmatprep.subr.bf16.mxu0 %v5847_v30  ;;  %v5937_v29 = vld [vmem:[#allocation7 + $0xd5c] ss:$24 sps:$4 sm:$0xff]   ;;  %v5932_v30 = vld [vmem:[#allocation7 + $0xd60] ss:$24 sps:$4 sm:$0xff]  }
 0x4ba   :  { %2932 = vmatpush1.bf16.msra.mxu1 %v5842_v31  ;;  %2809 = vmatpush1.bf16.msra.mxu0 %v5845_v32  ;;  %v5935_v31 = vld [vmem:[#allocation7 + $0xd58] ss:$24 sps:$4 sm:$0xff]   ;;  %v5940_v32 = vld [vmem:[#allocation7 + $0xd94] ss:$24 sps:$4 sm:$0xff]  }
 0x4bb   :  { %2933 = vmatprep.subr.bf16.mxu1 %v5850_v33  ;;  %2810 = vmatprep.subr.bf16.mxu0 %v5853_v34  ;;  %v5943_v33 = vld [vmem:[#allocation7 + $0xd8c] ss:$24 sps:$4 sm:$0xff]   ;;  %v5938_v34 = vld [vmem:[#allocation7 + $0xd90] ss:$24 sps:$4 sm:$0xff]  }
 0x4be   :  { %2934 = vmatpush1.bf16.msra.mxu1 %v5848_v35  ;;  %2811 = vmatpush1.bf16.msra.mxu0 %v5851_v39  ;;  %v5941_v35 = vld [vmem:[#allocation7 + $0xd88] ss:$24 sps:$4 sm:$0xff]   ;;  %v5946_v39 = vld [vmem:[#allocation7 + $0xdc4] ss:$24 sps:$4 sm:$0xff]  }
 0x4bf   :  { %2935 = vmatprep.subr.bf16.mxu1 %v5856_v40  ;;  %2812 = vmatprep.subr.bf16.mxu0 %v5859_v41  ;;  %v5949_v40 = vld [vmem:[#allocation7 + $0xdbc] ss:$24 sps:$4 sm:$0xff]   ;;  %v5944_v41 = vld [vmem:[#allocation7 + $0xdc0] ss:$24 sps:$4 sm:$0xff]  }
 0x4c2   :  { %2936 = vmatpush1.bf16.msra.mxu1 %v5854_v44  ;;  %2813 = vmatpush1.bf16.msra.mxu0 %v5857_v49  ;;  %v5947_v44 = vld [vmem:[#allocation7 + $0xdb8] ss:$24 sps:$4 sm:$0xff]   ;;  %v5952_v49 = vld [vmem:[#allocation7 + $0xdf4] ss:$24 sps:$4 sm:$0xff]  }
 0x4c3   :  { %2937 = vmatprep.subr.bf16.mxu1 %v5862_v53  ;;  %2814 = vmatprep.subr.bf16.mxu0 %v5865_v54  ;;  %v5955_v53 = vld [vmem:[#allocation7 + $0xdec] ss:$24 sps:$4 sm:$0xff]   ;;  %v5950_v54 = vld [vmem:[#allocation7 + $0xdf0] ss:$24 sps:$4 sm:$0xff]  }
 0x4c6   :  { %2938 = vmatpush1.bf16.msra.mxu1 %v5860_v55  ;;  %2815 = vmatpush1.bf16.msra.mxu0 %v5863_v56  ;;  %v5953_v55 = vld [vmem:[#allocation7 + $0xde8] ss:$24 sps:$4 sm:$0xff]   ;;  %v5958_v56 = vld [vmem:[#allocation7 + $0xe24] ss:$24 sps:$4 sm:$0xff]  }
 0x4c7   :  { %2939 = vmatprep.subr.bf16.mxu1 %v5868_v57  ;;  %2816 = vmatprep.subr.bf16.mxu0 %v5871_v58  ;;  %v5961_v57 = vld [vmem:[#allocation7 + $0xe1c] ss:$24 sps:$4 sm:$0xff]   ;;  %v5956_v58 = vld [vmem:[#allocation7 + $0xe20] ss:$24 sps:$4 sm:$0xff]  }
 0x4ca   :  { %2940 = vmatpush1.bf16.msra.mxu1 %v5866_v59  ;;  %2817 = vmatpush1.bf16.msra.mxu0 %v5869_v60  ;;  %v5959_v59 = vld [vmem:[#allocation7 + $0xe18] ss:$24 sps:$4 sm:$0xff]   ;;  %v5964_v60 = vld [vmem:[#allocation7 + $0xe54] ss:$24 sps:$4 sm:$0xff]  }
 0x4cb   :  { %2941 = vmatprep.subr.bf16.mxu1 %v5874_v61  ;;  %2818 = vmatprep.subr.bf16.mxu0 %v5877_v62  ;;  %v5967_v61 = vld [vmem:[#allocation7 + $0xe4c] ss:$24 sps:$4 sm:$0xff]   ;;  %v5962_v62 = vld [vmem:[#allocation7 + $0xe50] ss:$24 sps:$4 sm:$0xff]  }
 0x4ce   :  { %2942 = vmatpush1.bf16.msra.mxu1 %v5872_v63  ;;  %2819 = vmatpush1.bf16.msra.mxu0 %v5875_v0  ;;  %v5965_v63 = vld [vmem:[#allocation7 + $0xe48] ss:$24 sps:$4 sm:$0xff]   ;;  %v5970_v0 = vld [vmem:[#allocation7 + $0xe84] ss:$24 sps:$4 sm:$0xff]  }
 0x4cf   :  { %2943 = vmatprep.subr.bf16.mxu1 %v5880_v1  ;;  %2820 = vmatprep.subr.bf16.mxu0 %v5883_v2  ;;  %v5973_v1 = vld [vmem:[#allocation7 + $0xe7c] ss:$24 sps:$4 sm:$0xff]   ;;  %v5968_v2 = vld [vmem:[#allocation7 + $0xe80] ss:$24 sps:$4 sm:$0xff]  }
 0x4d2   :  { %2944 = vmatpush1.bf16.msra.mxu1 %v5878_v7  ;;  %2821 = vmatpush1.bf16.msra.mxu0 %v5881_v11  ;;  %v5971_v7 = vld [vmem:[#allocation7 + $0xe78] ss:$24 sps:$4 sm:$0xff]   ;;  %v5976_v11 = vld [vmem:[#allocation7 + $0xeb4] ss:$24 sps:$4 sm:$0xff]  }
 0x4d3   :  { %2945 = vmatprep.subr.bf16.mxu1 %v5886_v12  ;;  %2822 = vmatprep.subr.bf16.mxu0 %v5889_v13  ;;  %v5979_v12 = vld [vmem:[#allocation7 + $0xeac] ss:$24 sps:$4 sm:$0xff]   ;;  %v5974_v13 = vld [vmem:[#allocation7 + $0xeb0] ss:$24 sps:$4 sm:$0xff]  }
 0x4d6   :  { %2946 = vmatpush1.bf16.msra.mxu1 %v5884_v16  ;;  %2823 = vmatpush1.bf16.msra.mxu0 %v5887_v17  ;;  %v5977_v16 = vld [vmem:[#allocation7 + $0xea8] ss:$24 sps:$4 sm:$0xff]   ;;  %v5982_v17 = vld [vmem:[#allocation7 + $0xee4] ss:$24 sps:$4 sm:$0xff]  }
 0x4d7   :  { %2956 = vmatprep.subr.bf16.mxu1 %v5892_v18  ;;  %2833 = vmatprep.subr.bf16.mxu0 %v5895_v19  ;;  %v5985_v18 = vld [vmem:[#allocation7 + $0xedc] ss:$24 sps:$4 sm:$0xff]   ;;  %v5980_v19 = vld [vmem:[#allocation7 + $0xee0] ss:$24 sps:$4 sm:$0xff]  }
 0x4d9   :  { %2948 = vmatmul.mubr.bf16.vlgmr.msra.gmra.mrb[16].mxu1 %v6839_v52  ;;  %2825 = vmatmul.mubr.bf16.vlgmr.msra.gmra.mrb[8].mxu0 %v6839_v52  ;;  %v5913_v52 = vld [vmem:[#allocation7 + $0xc9c] ss:$24 sps:$4 sm:$0xff]  }
 0x4da   :  { %2957 = vmatpush1.bf16.msra.mxu1 %v5890_v20  ;;  %2988 = vmatprep.mubr.bf16.mxu1 %v6843_v36  ;;  %v5983_v20 = vld [vmem:[#allocation7 + $0xed8] ss:$24 sps:$4 sm:$0xff]  }
 0x4db   :  { %2834 = vmatpush1.bf16.msra.mxu0 %v5893_v21  ;;  %2865 = vmatprep.mubr.bf16.mxu0 %v6843_v36  ;;  %v5919_v36 = vld [vmem:[#allocation7 + $0xccc] ss:$24 sps:$4 sm:$0xff]  }
 0x4dc   :  { %2958 = vmatprep.subr.bf16.mxu1 %v5898_v22  ;;  %2835 = vmatprep.subr.bf16.mxu0 %v5901_v23  ;;  %v5988_v21 = vld [vmem:[#allocation7 + $0xf14] ss:$24 sps:$4 sm:$0xff]   ;;  %v5986_v23 = vld [vmem:[#allocation7 + $0xf10] ss:$24 sps:$4 sm:$0xff]  }
 0x4dd   :  { %v5991_v22 = vld [vmem:[#allocation7 + $0xf0c] ss:$24 sps:$4 sm:$0xff]  }
 0x4de   :  { %2959 = vmatpush1.bf16.msra.mxu1 %v5896_v37  ;;  %v5989_v37 = vld [vmem:[#allocation7 + $0xf08] ss:$24 sps:$4 sm:$0xff]  }
 0x4df   :  { %2836 = vmatpush1.bf16.msra.mxu0 %v5899_v38  ;;  %2960 = vmatprep.subr.bf16.mxu1 %v5904_v42  ;;  %v5994_v38 = vld [vmem:[#allocation7 + $0xf44] ss:$24 sps:$4 sm:$0xff]  }
 0x4e0   :  { %2837 = vmatprep.subr.bf16.mxu0 %v5907_v43  ;;  %v5997_v42 = vld [vmem:[#allocation7 + $0xf3c] ss:$24 sps:$4 sm:$0xff]   ;;  %v5992_v43 = vld [vmem:[#allocation7 + $0xf40] ss:$24 sps:$4 sm:$0xff]  }
 0x4e2   :  { %2961 = vmatpush1.bf16.msra.mxu1 %v5902_v45  ;;  %v5995_v45 = vld [vmem:[#allocation7 + $0xf38] ss:$24 sps:$4 sm:$0xff]  }
 0x4e3   :  { %2838 = vmatpush1.bf16.msra.mxu0 %v5905_v46  ;;  %2962 = vmatprep.subr.bf16.mxu1 %v5910_v47  ;;  %v6000_v46 = vld [vmem:[#allocation7 + $0xf74] ss:$24 sps:$4 sm:$0xff]  }
 0x4e4   :  { %2839 = vmatprep.subr.bf16.mxu0 %v5913_v52  ;;  %v6003_v47 = vld [vmem:[#allocation7 + $0xf6c] ss:$24 sps:$4 sm:$0xff]   ;;  %v5998_v52 = vld [vmem:[#allocation7 + $0xf70] ss:$24 sps:$4 sm:$0xff]  }
 0x4e6   :  { %2963 = vmatpush1.bf16.msra.mxu1 %v5908_v48  ;;  %v6001_v48 = vld [vmem:[#allocation7 + $0xf68] ss:$24 sps:$4 sm:$0xff]  }
 0x4e7   :  { %2840 = vmatpush1.bf16.msra.mxu0 %v5911_v50  ;;  %2964 = vmatprep.subr.bf16.mxu1 %v5916_v51  ;;  %v6006_v50 = vld [vmem:[#allocation7 + $0xfa4] ss:$24 sps:$4 sm:$0xff]   ;;  %v6004_v51 = vld [vmem:[#allocation7 + $0xfa0] ss:$24 sps:$4 sm:$0xff]  }
 0x4e8   :  { %2841 = vmatprep.subr.bf16.mxu0 %v5919_v36  ;;  %v6007_v36 = vld [vmem:[#allocation7 + $0xf98] ss:$24 sps:$4 sm:$0xff]  }
 0x4ea   :  { %2965 = vmatpush1.bf16.msra.mxu1 %v5914_v3  ;;  %v6012_v3 = vld [vmem:[#allocation7 + $0xfd4] ss:$24 sps:$4 sm:$0xff]  }
 0x4eb   :  { %2842 = vmatpush1.bf16.msra.mxu0 %v5917_v4  ;;  %2966 = vmatprep.subr.bf16.mxu1 %v5922_v5  ;;  %v6015_v4 = vld [vmem:[#allocation7 + $0xfcc] ss:$24 sps:$4 sm:$0xff]   ;;  %v6013_v5 = vld [vmem:[#allocation7 + $0xfc8] ss:$24 sps:$4 sm:$0xff]  }
 0x4ec   :  { %2843 = vmatprep.subr.bf16.mxu0 %v5925_v6  ;;  %v6018_v6 = vld [vmem:[#allocation7 + $0x1004] ss:$24 sps:$4 sm:$0xff]  }
 0x4ee   :  { %2967 = vmatpush1.bf16.msra.mxu1 %v5920_v8  ;;  %v6021_v8 = vld [vmem:[#allocation7 + $0xffc] ss:$24 sps:$4 sm:$0xff]  }
 0x4ef   :  { %2844 = vmatpush1.bf16.msra.mxu0 %v5923_v10  ;;  %2968 = vmatprep.subr.bf16.mxu1 %v5928_v24  ;;  %v6016_v10 = vld [vmem:[#allocation7 + $0x1000] ss:$24 sps:$4 sm:$0xff]  }
 0x4f0   :  { %2845 = vmatprep.subr.bf16.mxu0 %v5931_v25  ;;  %v6019_v24 = vld [vmem:[#allocation7 + $0xff8] ss:$24 sps:$4 sm:$0xff]   ;;  %v6024_v25 = vld [vmem:[#allocation7 + $0x1034] ss:$24 sps:$4 sm:$0xff]  }
 0x4f2   :  { %2969 = vmatpush1.bf16.msra.mxu1 %v5926_v26  ;;  %v6027_v26 = vld [vmem:[#allocation7 + $0x102c] ss:$24 sps:$4 sm:$0xff]  }
 0x4f3   :  { %2846 = vmatpush1.bf16.msra.mxu0 %v5929_v27  ;;  %2970 = vmatprep.subr.bf16.mxu1 %v5934_v28  ;;  %v6022_v27 = vld [vmem:[#allocation7 + $0x1030] ss:$24 sps:$4 sm:$0xff]  }
 0x4f4   :  { %2847 = vmatprep.subr.bf16.mxu0 %v5937_v29  ;;  %v6025_v28 = vld [vmem:[#allocation7 + $0x1028] ss:$24 sps:$4 sm:$0xff]   ;;  %v6030_v29 = vld [vmem:[#allocation7 + $0x1064] ss:$24 sps:$4 sm:$0xff]  }
 0x4f6   :  { %2971 = vmatpush1.bf16.msra.mxu1 %v5932_v30  ;;  %v6033_v30 = vld [vmem:[#allocation7 + $0x105c] ss:$24 sps:$4 sm:$0xff]  }
 0x4f7   :  { %2848 = vmatpush1.bf16.msra.mxu0 %v5935_v31  ;;  %2972 = vmatprep.subr.bf16.mxu1 %v5940_v32  ;;  %v6028_v31 = vld [vmem:[#allocation7 + $0x1060] ss:$24 sps:$4 sm:$0xff]  }
 0x4f8   :  { %2849 = vmatprep.subr.bf16.mxu0 %v5943_v33  ;;  %v6031_v32 = vld [vmem:[#allocation7 + $0x1058] ss:$24 sps:$4 sm:$0xff]   ;;  %v6036_v33 = vld [vmem:[#allocation7 + $0x1094] ss:$24 sps:$4 sm:$0xff]  }
 0x4fa   :  { %2973 = vmatpush1.bf16.msra.mxu1 %v5938_v34  ;;  %v6039_v34 = vld [vmem:[#allocation7 + $0x108c] ss:$24 sps:$4 sm:$0xff]  }
 0x4fb   :  { %2850 = vmatpush1.bf16.msra.mxu0 %v5941_v35  ;;  %2974 = vmatprep.subr.bf16.mxu1 %v5946_v39  ;;  %v6034_v35 = vld [vmem:[#allocation7 + $0x1090] ss:$24 sps:$4 sm:$0xff]  }
 0x4fc   :  { %2851 = vmatprep.subr.bf16.mxu0 %v5949_v40  ;;  %v6037_v39 = vld [vmem:[#allocation7 + $0x1088] ss:$24 sps:$4 sm:$0xff]   ;;  %v6042_v40 = vld [vmem:[#allocation7 + $0x10c4] ss:$24 sps:$4 sm:$0xff]  }
 0x4fe   :  { %2975 = vmatpush1.bf16.msra.mxu1 %v5944_v41  ;;  %v6045_v41 = vld [vmem:[#allocation7 + $0x10bc] ss:$24 sps:$4 sm:$0xff]  }
 0x4ff   :  { %2852 = vmatpush1.bf16.msra.mxu0 %v5947_v44  ;;  %2976 = vmatprep.subr.bf16.mxu1 %v5952_v49  ;;  %v6040_v44 = vld [vmem:[#allocation7 + $0x10c0] ss:$24 sps:$4 sm:$0xff]  }
 0x500   :  { %2853 = vmatprep.subr.bf16.mxu0 %v5955_v53  ;;  %v6043_v49 = vld [vmem:[#allocation7 + $0x10b8] ss:$24 sps:$4 sm:$0xff]   ;;  %v6048_v53 = vld [vmem:[#allocation7 + $0x10f4] ss:$24 sps:$4 sm:$0xff]  }
 0x502   :  { %2977 = vmatpush1.bf16.msra.mxu1 %v5950_v54  ;;  %v6051_v54 = vld [vmem:[#allocation7 + $0x10ec] ss:$24 sps:$4 sm:$0xff]  }
 0x503   :  { %2854 = vmatpush1.bf16.msra.mxu0 %v5953_v55  ;;  %2978 = vmatprep.subr.bf16.mxu1 %v5958_v56  ;;  %v6046_v55 = vld [vmem:[#allocation7 + $0x10f0] ss:$24 sps:$4 sm:$0xff]  }
 0x504   :  { %2855 = vmatprep.subr.bf16.mxu0 %v5961_v57  ;;  %v6049_v56 = vld [vmem:[#allocation7 + $0x10e8] ss:$24 sps:$4 sm:$0xff]   ;;  %v6054_v57 = vld [vmem:[#allocation7 + $0x1124] ss:$24 sps:$4 sm:$0xff]  }
 0x506   :  { %2979 = vmatpush1.bf16.msra.mxu1 %v5956_v58  ;;  %v6057_v58 = vld [vmem:[#allocation7 + $0x111c] ss:$24 sps:$4 sm:$0xff]  }
 0x507   :  { %2856 = vmatpush1.bf16.msra.mxu0 %v5959_v59  ;;  %2980 = vmatprep.subr.bf16.mxu1 %v5964_v60  ;;  %v6052_v59 = vld [vmem:[#allocation7 + $0x1120] ss:$24 sps:$4 sm:$0xff]  }
 0x508   :  { %2857 = vmatprep.subr.bf16.mxu0 %v5967_v61  ;;  %v6055_v60 = vld [vmem:[#allocation7 + $0x1118] ss:$24 sps:$4 sm:$0xff]   ;;  %v6060_v61 = vld [vmem:[#allocation7 + $0x1154] ss:$24 sps:$4 sm:$0xff]  }
 0x50a   :  { %2981 = vmatpush1.bf16.msra.mxu1 %v5962_v62  ;;  %v6063_v62 = vld [vmem:[#allocation7 + $0x114c] ss:$24 sps:$4 sm:$0xff]  }
 0x50b   :  { %2858 = vmatpush1.bf16.msra.mxu0 %v5965_v63  ;;  %2982 = vmatprep.subr.bf16.mxu1 %v5970_v0  ;;  %v6058_v63 = vld [vmem:[#allocation7 + $0x1150] ss:$24 sps:$4 sm:$0xff]  }
 0x50c   :  { %2859 = vmatprep.subr.bf16.mxu0 %v5973_v1  ;;  %v6061_v0 = vld [vmem:[#allocation7 + $0x1148] ss:$24 sps:$4 sm:$0xff]   ;;  %v6066_v1 = vld [vmem:[#allocation7 + $0x1184] ss:$24 sps:$4 sm:$0xff]  }
 0x50e   :  { %2983 = vmatpush1.bf16.msra.mxu1 %v5968_v2  ;;  %v6069_v2 = vld [vmem:[#allocation7 + $0x117c] ss:$24 sps:$4 sm:$0xff]  }
 0x50f   :  { %2860 = vmatpush1.bf16.msra.mxu0 %v5971_v7  ;;  %2984 = vmatprep.subr.bf16.mxu1 %v5976_v11  ;;  %v6064_v7 = vld [vmem:[#allocation7 + $0x1180] ss:$24 sps:$4 sm:$0xff]  }
 0x510   :  { %2861 = vmatprep.subr.bf16.mxu0 %v5979_v12  ;;  %v6067_v11 = vld [vmem:[#allocation7 + $0x1178] ss:$24 sps:$4 sm:$0xff]   ;;  %v6072_v12 = vld [vmem:[#allocation7 + $0x11b4] ss:$24 sps:$4 sm:$0xff]  }
 0x512   :  { %2985 = vmatpush1.bf16.msra.mxu1 %v5974_v13  ;;  %v6075_v13 = vld [vmem:[#allocation7 + $0x11ac] ss:$24 sps:$4 sm:$0xff]  }
 0x513   :  { %2862 = vmatpush1.bf16.msra.mxu0 %v5977_v16  ;;  %2986 = vmatprep.subr.bf16.mxu1 %v5982_v17  ;;  %v6070_v16 = vld [vmem:[#allocation7 + $0x11b0] ss:$24 sps:$4 sm:$0xff]  }
 0x514   :  { %2863 = vmatprep.subr.bf16.mxu0 %v5985_v18  ;;  %v6073_v17 = vld [vmem:[#allocation7 + $0x11a8] ss:$24 sps:$4 sm:$0xff]   ;;  %v6078_v18 = vld [vmem:[#allocation7 + $0x11e4] ss:$24 sps:$4 sm:$0xff]  }
 0x516   :  { %2987 = vmatpush1.bf16.msra.mxu1 %v5980_v19  ;;  %v6081_v19 = vld [vmem:[#allocation7 + $0x11dc] ss:$24 sps:$4 sm:$0xff]  }
 0x517   :  { %2864 = vmatpush1.bf16.msra.mxu0 %v5983_v20  ;;  %2997 = vmatprep.subr.bf16.mxu1 %v5988_v21  ;;  %v6076_v20 = vld [vmem:[#allocation7 + $0x11e0] ss:$24 sps:$4 sm:$0xff]  }
 0x518   :  { %2874 = vmatprep.subr.bf16.mxu0 %v5991_v22  ;;  %v6079_v21 = vld [vmem:[#allocation7 + $0x11d8] ss:$24 sps:$4 sm:$0xff]   ;;  %v6084_v22 = vld [vmem:[#allocation7 + $0x4] ss:$24 sps:$4 sm:$0xff]  }
 0x519   :  { %2989 = vmatmul.mubr.bf16.vlgmr.msra.gmra.mrb[16].mxu1 %v6848_v14 }
 0x51a   :  { %2866 = vmatmul.mubr.bf16.vlgmr.msra.gmra.mrb[8].mxu0 %v6848_v14  ;;  %2998 = vmatpush1.bf16.msra.mxu1 %v5986_v23  ;;  %v6009_v14 = vld [vmem:[#allocation7 + $0xf9c] ss:$24 sps:$4 sm:$0xff]   ;;  %v6087_v23 = vld [vmem:[#allocation7 + $0xc] ss:$24 sps:$4 sm:$0xff]  }
 0x51b   :  { %3029 = vmatprep.mubr.bf16.mxu1 %v6846_v9  ;;  %2875 = vmatpush1.bf16.msra.mxu0 %v5989_v37  ;;  %v6082_v37 = vld [vmem:[#allocation7] ss:$24 sps:$4 sm:$0xff]  }
 0x51c   :  { %2906 = vmatprep.mubr.bf16.mxu0 %v6846_v9  ;;  %2999 = vmatprep.subr.bf16.mxu1 %v5994_v38  ;;  %v6010_v9 = vld [vmem:[#allocation7 + $0xfd0] ss:$24 sps:$4 sm:$0xff]  }
 0x51d   :  { %2876 = vmatprep.subr.bf16.mxu0 %v5997_v42  ;;  %v6085_v38 = vld [vmem:[#allocation7 + $0x8] ss:$24 sps:$4 sm:$0xff]   ;;  %v6090_v42 = vld [vmem:[#allocation7 + $0x34] ss:$24 sps:$4 sm:$0xff]  }
 0x51e   :  { %3000 = vmatpush1.bf16.msra.mxu1 %v5992_v43  ;;  %v6093_v43 = vld [vmem:[#allocation7 + $0x3c] ss:$24 sps:$4 sm:$0xff]  }
 0x51f   :  { %2877 = vmatpush1.bf16.msra.mxu0 %v5995_v45  ;;  %3001 = vmatprep.subr.bf16.mxu1 %v6000_v46  ;;  %v6528_v45 = vld [vmem:[#allocation2 + $0x8] sm:$0xff] }
 0x520   :  { %2878 = vmatprep.subr.bf16.mxu0 %v6003_v47  ;;  %v6865_v46 = vpack.c.bf16 %v6528_v45, %v6528_v45  ;;  %v6088_v47 = vld [vmem:[#allocation7 + $0x30] ss:$24 sps:$4 sm:$0xff]   ;;  %v6180_v45 = vld [vmem:[#allocation7 + $0x304] ss:$24 sps:$4 sm:$0xff]  }
 0x522   :  { %3002 = vmatpush1.bf16.msra.mxu1 %v5998_v52  ;;  %v6091_v52 = vld [vmem:[#allocation7 + $0x38] ss:$24 sps:$4 sm:$0xff]  }
 0x523   :  { %2879 = vmatpush1.bf16.msra.mxu0 %v6001_v48  ;;  %3003 = vmatprep.subr.bf16.mxu1 %v6006_v50  ;;  %v6096_v48 = vld [vmem:[#allocation7 + $0x64] ss:$24 sps:$4 sm:$0xff]  }
 0x524   :  { %2880 = vmatprep.subr.bf16.mxu0 %v6009_v14  ;;  %v6099_v50 = vld [vmem:[#allocation7 + $0x6c] ss:$24 sps:$4 sm:$0xff]   ;;  %v6094_v14 = vld [vmem:[#allocation7 + $0x60] ss:$24 sps:$4 sm:$0xff]  }
 0x526   :  { %3004 = vmatpush1.bf16.msra.mxu1 %v6004_v51  ;;  %v6097_v51 = vld [vmem:[#allocation7 + $0x68] ss:$24 sps:$4 sm:$0xff]  }
 0x527   :  { %2881 = vmatpush1.bf16.msra.mxu0 %v6007_v36  ;;  %3005 = vmatprep.subr.bf16.mxu1 %v6012_v3  ;;  %v6102_v36 = vld [vmem:[#allocation7 + $0x94] ss:$24 sps:$4 sm:$0xff]   ;;  %v6100_v3 = vld [vmem:[#allocation7 + $0x90] ss:$24 sps:$4 sm:$0xff]  }
 0x528   :  { %2882 = vmatprep.subr.bf16.mxu0 %v6015_v4  ;;  %v6103_v4 = vld [vmem:[#allocation7 + $0x98] ss:$24 sps:$4 sm:$0xff]  }
 0x52a   :  { %3006 = vmatpush1.bf16.msra.mxu1 %v6010_v9  ;;  %v6108_v9 = vld [vmem:[#allocation7 + $0xc4] ss:$24 sps:$4 sm:$0xff]  }
 0x52b   :  { %2883 = vmatpush1.bf16.msra.mxu0 %v6013_v5  ;;  %3007 = vmatprep.subr.bf16.mxu1 %v6018_v6  ;;  %v6111_v5 = vld [vmem:[#allocation7 + $0xcc] ss:$24 sps:$4 sm:$0xff]   ;;  %v6106_v6 = vld [vmem:[#allocation7 + $0xc0] ss:$24 sps:$4 sm:$0xff]  }
 0x52c   :  { %2884 = vmatprep.subr.bf16.mxu0 %v6021_v8  ;;  %v6109_v8 = vld [vmem:[#allocation7 + $0xc8] ss:$24 sps:$4 sm:$0xff]  }
 0x52e   :  { %3008 = vmatpush1.bf16.msra.mxu1 %v6016_v10  ;;  %v6114_v10 = vld [vmem:[#allocation7 + $0xf4] ss:$24 sps:$4 sm:$0xff]  }
 0x52f   :  { %2885 = vmatpush1.bf16.msra.mxu0 %v6019_v24  ;;  %3009 = vmatprep.subr.bf16.mxu1 %v6024_v25  ;;  %v6117_v24 = vld [vmem:[#allocation7 + $0xfc] ss:$24 sps:$4 sm:$0xff]   ;;  %v6112_v25 = vld [vmem:[#allocation7 + $0xf0] ss:$24 sps:$4 sm:$0xff]  }
 0x530   :  { %2886 = vmatprep.subr.bf16.mxu0 %v6027_v26  ;;  %v6115_v26 = vld [vmem:[#allocation7 + $0xf8] ss:$24 sps:$4 sm:$0xff]  }
 0x532   :  { %3010 = vmatpush1.bf16.msra.mxu1 %v6022_v27  ;;  %v6120_v27 = vld [vmem:[#allocation7 + $0x124] ss:$24 sps:$4 sm:$0xff]  }
 0x533   :  { %2887 = vmatpush1.bf16.msra.mxu0 %v6025_v28  ;;  %3011 = vmatprep.subr.bf16.mxu1 %v6030_v29  ;;  %v6123_v29 = vld [vmem:[#allocation7 + $0x12c] ss:$24 sps:$4 sm:$0xff]  }
 0x534   :  { %2888 = vmatprep.subr.bf16.mxu0 %v6033_v30 }
 0x536   :  { %3012 = vmatpush1.bf16.msra.mxu1 %v6028_v31 }
 0x537   :  { %2889 = vmatpush1.bf16.msra.mxu0 %v6031_v32  ;;  %3013 = vmatprep.subr.bf16.mxu1 %v6036_v33  ;;  %v6118_v32 = vld [vmem:[#allocation7 + $0x120] ss:$24 sps:$4 sm:$0xff]  }
 0x538   :  { %2890 = vmatprep.subr.bf16.mxu0 %v6039_v34  ;;  %v6121_v34 = vld [vmem:[#allocation7 + $0x128] ss:$24 sps:$4 sm:$0xff]  }
 0x53a   :  { %3014 = vmatpush1.bf16.msra.mxu1 %v6034_v35  ;;  %v6126_v35 = vld [vmem:[#allocation7 + $0x154] ss:$24 sps:$4 sm:$0xff]  }
 0x53b   :  { %2891 = vmatpush1.bf16.msra.mxu0 %v6037_v39  ;;  %3015 = vmatprep.subr.bf16.mxu1 %v6042_v40  ;;  %v6129_v39 = vld [vmem:[#allocation7 + $0x15c] ss:$24 sps:$4 sm:$0xff]   ;;  %v6124_v40 = vld [vmem:[#allocation7 + $0x150] ss:$24 sps:$4 sm:$0xff]  }
 0x53c   :  { %2892 = vmatprep.subr.bf16.mxu0 %v6045_v41  ;;  %v6127_v41 = vld [vmem:[#allocation7 + $0x158] ss:$24 sps:$4 sm:$0xff]  }
 0x53e   :  { %3016 = vmatpush1.bf16.msra.mxu1 %v6040_v44  ;;  %v6132_v44 = vld [vmem:[#allocation7 + $0x184] ss:$24 sps:$4 sm:$0xff]  }
 0x53f   :  { %2893 = vmatpush1.bf16.msra.mxu0 %v6043_v49  ;;  %3017 = vmatprep.subr.bf16.mxu1 %v6048_v53  ;;  %v6135_v49 = vld [vmem:[#allocation7 + $0x18c] ss:$24 sps:$4 sm:$0xff]   ;;  %v6130_v53 = vld [vmem:[#allocation7 + $0x180] ss:$24 sps:$4 sm:$0xff]  }
 0x540   :  { %2894 = vmatprep.subr.bf16.mxu0 %v6051_v54  ;;  %v6133_v54 = vld [vmem:[#allocation7 + $0x188] ss:$24 sps:$4 sm:$0xff]  }
 0x542   :  { %3018 = vmatpush1.bf16.msra.mxu1 %v6046_v55  ;;  %v6138_v55 = vld [vmem:[#allocation7 + $0x1b4] ss:$24 sps:$4 sm:$0xff]  }
 0x543   :  { %2895 = vmatpush1.bf16.msra.mxu0 %v6049_v56  ;;  %3019 = vmatprep.subr.bf16.mxu1 %v6054_v57  ;;  %v6141_v56 = vld [vmem:[#allocation7 + $0x1bc] ss:$24 sps:$4 sm:$0xff]   ;;  %v6136_v57 = vld [vmem:[#allocation7 + $0x1b0] ss:$24 sps:$4 sm:$0xff]  }
 0x544   :  { %2896 = vmatprep.subr.bf16.mxu0 %v6057_v58  ;;  %v6139_v58 = vld [vmem:[#allocation7 + $0x1b8] ss:$24 sps:$4 sm:$0xff]  }
 0x546   :  { %3020 = vmatpush1.bf16.msra.mxu1 %v6052_v59  ;;  %v6144_v59 = vld [vmem:[#allocation7 + $0x1e4] ss:$24 sps:$4 sm:$0xff]  }
 0x547   :  { %2897 = vmatpush1.bf16.msra.mxu0 %v6055_v60  ;;  %3021 = vmatprep.subr.bf16.mxu1 %v6060_v61  ;;  %v6147_v60 = vld [vmem:[#allocation7 + $0x1ec] ss:$24 sps:$4 sm:$0xff]   ;;  %v6142_v61 = vld [vmem:[#allocation7 + $0x1e0] ss:$24 sps:$4 sm:$0xff]  }
 0x548   :  { %2898 = vmatprep.subr.bf16.mxu0 %v6063_v62  ;;  %v6145_v62 = vld [vmem:[#allocation7 + $0x1e8] ss:$24 sps:$4 sm:$0xff]  }
 0x54a   :  { %3022 = vmatpush1.bf16.msra.mxu1 %v6058_v63  ;;  %v6150_v63 = vld [vmem:[#allocation7 + $0x214] ss:$24 sps:$4 sm:$0xff]  }
 0x54b   :  { %2899 = vmatpush1.bf16.msra.mxu0 %v6061_v0  ;;  %3023 = vmatprep.subr.bf16.mxu1 %v6066_v1  ;;  %v6153_v0 = vld [vmem:[#allocation7 + $0x21c] ss:$24 sps:$4 sm:$0xff]   ;;  %v6148_v1 = vld [vmem:[#allocation7 + $0x210] ss:$24 sps:$4 sm:$0xff]  }
 0x54c   :  { %2900 = vmatprep.subr.bf16.mxu0 %v6069_v2  ;;  %v6151_v2 = vld [vmem:[#allocation7 + $0x218] ss:$24 sps:$4 sm:$0xff]  }
 0x54e   :  { %3024 = vmatpush1.bf16.msra.mxu1 %v6064_v7  ;;  %v6156_v7 = vld [vmem:[#allocation7 + $0x244] ss:$24 sps:$4 sm:$0xff]  }
 0x54f   :  { %2901 = vmatpush1.bf16.msra.mxu0 %v6067_v11  ;;  %3025 = vmatprep.subr.bf16.mxu1 %v6072_v12  ;;  %v6159_v11 = vld [vmem:[#allocation7 + $0x24c] ss:$24 sps:$4 sm:$0xff]   ;;  %v6154_v12 = vld [vmem:[#allocation7 + $0x240] ss:$24 sps:$4 sm:$0xff]  }
 0x550   :  { %2902 = vmatprep.subr.bf16.mxu0 %v6075_v13  ;;  %v6157_v13 = vld [vmem:[#allocation7 + $0x248] ss:$24 sps:$4 sm:$0xff]  }
 0x552   :  { %3026 = vmatpush1.bf16.msra.mxu1 %v6070_v16  ;;  %v6162_v16 = vld [vmem:[#allocation7 + $0x274] ss:$24 sps:$4 sm:$0xff]  }
 0x553   :  { %2903 = vmatpush1.bf16.msra.mxu0 %v6073_v17  ;;  %3027 = vmatprep.subr.bf16.mxu1 %v6078_v18  ;;  %v6165_v17 = vld [vmem:[#allocation7 + $0x27c] ss:$24 sps:$4 sm:$0xff]   ;;  %v6160_v18 = vld [vmem:[#allocation7 + $0x270] ss:$24 sps:$4 sm:$0xff]  }
 0x554   :  { %2904 = vmatprep.subr.bf16.mxu0 %v6081_v19  ;;  %v6163_v19 = vld [vmem:[#allocation7 + $0x278] ss:$24 sps:$4 sm:$0xff]  }
 0x556   :  { %3028 = vmatpush1.bf16.msra.mxu1 %v6076_v20  ;;  %v6168_v20 = vld [vmem:[#allocation7 + $0x2a4] ss:$24 sps:$4 sm:$0xff]  }
 0x557   :  { %2905 = vmatpush1.bf16.msra.mxu0 %v6079_v21  ;;  %4478 = vmatprep.subr.bf16.mxu1 %v6084_v22  ;;  %v6171_v21 = vld [vmem:[#allocation7 + $0x2ac] ss:$24 sps:$4 sm:$0xff]   ;;  %v6166_v22 = vld [vmem:[#allocation7 + $0x2a0] ss:$24 sps:$4 sm:$0xff]  }
 0x558   :  { %4601 = vmatprep.subr.bf16.mxu0 %v6087_v23  ;;  %v6169_v23 = vld [vmem:[#allocation7 + $0x2a8] ss:$24 sps:$4 sm:$0xff]  }
 0x559   :  { %3030 = vmatmul.mubr.bf16.vlgmr.msra.gmra.mrb[16].mxu1 %v6850_v15 }
 0x55a   :  { %2907 = vmatmul.mubr.bf16.vlgmr.msra.gmra.mrb[8].mxu0 %v6850_v15  ;;  %4479 = vmatpush1.bf16.msra.mxu1 %v6082_v37  ;;  %v6105_v15 = vld [vmem:[#allocation7 + $0x9c] ss:$24 sps:$4 sm:$0xff]  }
 0x55b   :  { %4602 = vmatpush1.bf16.msra.mxu0 %v6085_v38  ;;  %4480 = vmatprep.subr.bf16.mxu1 %v6090_v42  ;;  %v6174_v37 = vld [vmem:[#allocation7 + $0x2d4] ss:$24 sps:$4 sm:$0xff]   ;;  %v6172_v42 = vld [vmem:[#allocation7 + $0x2d0] ss:$24 sps:$4 sm:$0xff]  }
 0x55c   :  { %4603 = vmatprep.subr.bf16.mxu0 %v6093_v43  ;;  %4510 = vmatprep.mubr.bf16.mxu1 %v6865_v46  ;;  %v6177_v38 = vld [vmem:[#allocation7 + $0x2dc] ss:$24 sps:$4 sm:$0xff]   ;;  %v6175_v43 = vld [vmem:[#allocation7 + $0x2d8] ss:$24 sps:$4 sm:$0xff]  }
 0x55d   :  { %4633 = vmatprep.mubr.bf16.mxu0 %v6865_v46 }
 0x55e   :  { %4481 = vmatpush1.bf16.msra.mxu1 %v6088_v47  ;;  %v6183_v47 = vld [vmem:[#allocation7 + $0x30c] ss:$24 sps:$4 sm:$0xff]  }
 0x55f   :  { %4604 = vmatpush1.bf16.msra.mxu0 %v6091_v52  ;;  %4482 = vmatprep.subr.bf16.mxu1 %v6096_v48  ;;  %v6875_v52 = vld [vmem:[#allocation2] sm:$0xff] }
 0x560   :  { %4605 = vmatprep.subr.bf16.mxu0 %v6099_v50  ;;  %v6879_v48 = vpack.c.bf16 %v6875_v52, %v6875_v52  ;;  %v6178_v50 = vld [vmem:[#allocation7 + $0x300] ss:$24 sps:$4 sm:$0xff]  }
 0x562   :  { %4483 = vmatpush1.bf16.msra.mxu1 %v6094_v14  ;;  %v6181_v14 = vld [vmem:[#allocation7 + $0x308] ss:$24 sps:$4 sm:$0xff]  }
 0x563   :  { %4606 = vmatpush1.bf16.msra.mxu0 %v6097_v51  ;;  %4484 = vmatprep.subr.bf16.mxu1 %v6102_v36  ;;  %v6186_v51 = vld [vmem:[#allocation7 + $0x334] ss:$24 sps:$4 sm:$0xff]  }
 0x564   :  { %4607 = vmatprep.subr.bf16.mxu0 %v6105_v15  ;;  %v6189_v36 = vld [vmem:[#allocation7 + $0x33c] ss:$24 sps:$4 sm:$0xff]   ;;  %v6881_v15 = vld [vmem:[#allocation2 + $0x18] sm:$0xff] }
 0x566   :  { %4485 = vmatpush1.bf16.msra.mxu1 %v6100_v3  ;;  %v6885_v3 = vpack.c.bf16 %v6881_v15, %v6881_v15 }
 0x567   :  { %4608 = vmatpush1.bf16.msra.mxu0 %v6103_v4  ;;  %4486 = vmatprep.subr.bf16.mxu1 %v6108_v9  ;;  %v6184_v4 = vld [vmem:[#allocation7 + $0x330] ss:$24 sps:$4 sm:$0xff]  }
 0x568   :  { %4609 = vmatprep.subr.bf16.mxu0 %v6111_v5  ;;  %v6187_v9 = vld [vmem:[#allocation7 + $0x338] ss:$24 sps:$4 sm:$0xff]   ;;  %v6192_v5 = vld [vmem:[#allocation7 + $0x364] ss:$24 sps:$4 sm:$0xff]  }
 0x56a   :  { %4487 = vmatpush1.bf16.msra.mxu1 %v6106_v6  ;;  %v6195_v6 = vld [vmem:[#allocation7 + $0x36c] ss:$24 sps:$4 sm:$0xff]  }
 0x56b   :  { %4610 = vmatpush1.bf16.msra.mxu0 %v6109_v8  ;;  %4488 = vmatprep.subr.bf16.mxu1 %v6114_v10  ;;  %v6190_v8 = vld [vmem:[#allocation7 + $0x360] ss:$24 sps:$4 sm:$0xff]  }
 0x56c   :  { %v6871_v28 = vpop.f32.mrb[4].mxu0  ;;  %4611 = vmatprep.subr.bf16.mxu0 %v6117_v24  ;;  %v6193_v10 = vld [vmem:[#allocation7 + $0x368] ss:$24 sps:$4 sm:$0xff]   ;;  %v6198_v24 = vld [vmem:[#allocation7 + $0x394] ss:$24 sps:$4 sm:$0xff]  }
 0x56d   :  { %v6873_v30 = vpop.f32.mrb[5].mxu0 }
 0x56e   :  { %4489 = vmatpush1.bf16.msra.mxu1 %v6112_v25  ;;  %v2748_v31 = vpop.f32.mrb[6].mxu0  ;;  %v6201_v25 = vld [vmem:[#allocation7 + $0x39c] ss:$24 sps:$4 sm:$0xff]  }
 0x56f   :  { %4612 = vmatpush1.bf16.msra.mxu0 %v6115_v26  ;;  %v2749_v33 = vpop.f32.mrb[7].mxu0  ;;  %4490 = vmatprep.subr.bf16.mxu1 %v6120_v27  ;;  %v6196_v26 = vld [vmem:[#allocation7 + $0x390] ss:$24 sps:$4 sm:$0xff]   ;;  %v6207_v31 = vld [vmem:[#allocation7 + $0x3cc] ss:$24 sps:$4 sm:$0xff]  }
 0x570   :  { %4613 = vmatprep.subr.bf16.mxu0 %v6123_v29  ;;  %v6199_v27 = vld [vmem:[#allocation7 + $0x398] ss:$24 sps:$4 sm:$0xff]   ;;  %v6204_v29 = vld [vmem:[#allocation7 + $0x3c4] ss:$24 sps:$4 sm:$0xff]   ;;  %v6205_v33 = vld [vmem:[#allocation7 + $0x3c8] ss:$24 sps:$4 sm:$0xff]  }
 0x572   :  { %4491 = vmatpush1.bf16.msra.mxu1 %v6118_v32  ;;  %v6202_v32 = vld [vmem:[#allocation7 + $0x3c0] ss:$24 sps:$4 sm:$0xff]  }
 0x573   :  { %4614 = vmatpush1.bf16.msra.mxu0 %v6121_v34  ;;  %4492 = vmatprep.subr.bf16.mxu1 %v6126_v35  ;;  %v6210_v34 = vld [vmem:[#allocation7 + $0x3f4] ss:$24 sps:$4 sm:$0xff]  }
 0x574   :  { %4615 = vmatprep.subr.bf16.mxu0 %v6129_v39  ;;  %v6213_v35 = vld [vmem:[#allocation7 + $0x3fc] ss:$24 sps:$4 sm:$0xff]   ;;  %v6208_v39 = vld [vmem:[#allocation7 + $0x3f0] ss:$24 sps:$4 sm:$0xff]  }
 0x576   :  { %4493 = vmatpush1.bf16.msra.mxu1 %v6124_v40  ;;  %v6211_v40 = vld [vmem:[#allocation7 + $0x3f8] ss:$24 sps:$4 sm:$0xff]  }
 0x577   :  { %4616 = vmatpush1.bf16.msra.mxu0 %v6127_v41  ;;  %4494 = vmatprep.subr.bf16.mxu1 %v6132_v44  ;;  %v6216_v41 = vld [vmem:[#allocation7 + $0x424] ss:$24 sps:$4 sm:$0xff]  }
 0x578   :  { %4617 = vmatprep.subr.bf16.mxu0 %v6135_v49  ;;  %v6219_v44 = vld [vmem:[#allocation7 + $0x42c] ss:$24 sps:$4 sm:$0xff]   ;;  %v6214_v49 = vld [vmem:[#allocation7 + $0x420] ss:$24 sps:$4 sm:$0xff]  }
 0x57a   :  { %4495 = vmatpush1.bf16.msra.mxu1 %v6130_v53  ;;  %v6217_v53 = vld [vmem:[#allocation7 + $0x428] ss:$24 sps:$4 sm:$0xff]  }
 0x57b   :  { %4618 = vmatpush1.bf16.msra.mxu0 %v6133_v54  ;;  %4496 = vmatprep.subr.bf16.mxu1 %v6138_v55  ;;  %v6222_v54 = vld [vmem:[#allocation7 + $0x454] ss:$24 sps:$4 sm:$0xff]  }
 0x57c   :  { %4619 = vmatprep.subr.bf16.mxu0 %v6141_v56  ;;  %v6225_v55 = vld [vmem:[#allocation7 + $0x45c] ss:$24 sps:$4 sm:$0xff]   ;;  %v6220_v56 = vld [vmem:[#allocation7 + $0x450] ss:$24 sps:$4 sm:$0xff]  }
 0x57e   :  { %4497 = vmatpush1.bf16.msra.mxu1 %v6136_v57  ;;  %v6223_v57 = vld [vmem:[#allocation7 + $0x458] ss:$24 sps:$4 sm:$0xff]  }
 0x57f   :  { %4620 = vmatpush1.bf16.msra.mxu0 %v6139_v58  ;;  %4498 = vmatprep.subr.bf16.mxu1 %v6144_v59  ;;  %v6228_v58 = vld [vmem:[#allocation7 + $0x484] ss:$24 sps:$4 sm:$0xff]  }
 0x580   :  { %4621 = vmatprep.subr.bf16.mxu0 %v6147_v60  ;;  %v6231_v59 = vld [vmem:[#allocation7 + $0x48c] ss:$24 sps:$4 sm:$0xff]   ;;  %v6226_v60 = vld [vmem:[#allocation7 + $0x480] ss:$24 sps:$4 sm:$0xff]  }
 0x582   :  { %4499 = vmatpush1.bf16.msra.mxu1 %v6142_v61  ;;  %v6229_v61 = vld [vmem:[#allocation7 + $0x488] ss:$24 sps:$4 sm:$0xff]  }
 0x583   :  { %4622 = vmatpush1.bf16.msra.mxu0 %v6145_v62  ;;  %4500 = vmatprep.subr.bf16.mxu1 %v6150_v63  ;;  %v6234_v62 = vld [vmem:[#allocation7 + $0x4b4] ss:$24 sps:$4 sm:$0xff]  }
 0x584   :  { %4623 = vmatprep.subr.bf16.mxu0 %v6153_v0  ;;  %v6237_v63 = vld [vmem:[#allocation7 + $0x4bc] ss:$24 sps:$4 sm:$0xff]   ;;  %v6232_v0 = vld [vmem:[#allocation7 + $0x4b0] ss:$24 sps:$4 sm:$0xff]  }
 0x586   :  { %4501 = vmatpush1.bf16.msra.mxu1 %v6148_v1  ;;  %v6235_v1 = vld [vmem:[#allocation7 + $0x4b8] ss:$24 sps:$4 sm:$0xff]  }
 0x587   :  { %4624 = vmatpush1.bf16.msra.mxu0 %v6151_v2  ;;  %4502 = vmatprep.subr.bf16.mxu1 %v6156_v7  ;;  %v6240_v2 = vld [vmem:[#allocation7 + $0x4e4] ss:$24 sps:$4 sm:$0xff]  }
 0x588   :  { %4625 = vmatprep.subr.bf16.mxu0 %v6159_v11  ;;  %v6243_v7 = vld [vmem:[#allocation7 + $0x4ec] ss:$24 sps:$4 sm:$0xff]   ;;  %v6238_v11 = vld [vmem:[#allocation7 + $0x4e0] ss:$24 sps:$4 sm:$0xff]  }
 0x58a   :  { %4503 = vmatpush1.bf16.msra.mxu1 %v6154_v12  ;;  %v6241_v12 = vld [vmem:[#allocation7 + $0x4e8] ss:$24 sps:$4 sm:$0xff]  }
 0x58b   :  { %4626 = vmatpush1.bf16.msra.mxu0 %v6157_v13  ;;  %4504 = vmatprep.subr.bf16.mxu1 %v6162_v16  ;;  %v6246_v13 = vld [vmem:[#allocation7 + $0x514] ss:$24 sps:$4 sm:$0xff]  }
 0x58c   :  { %4627 = vmatprep.subr.bf16.mxu0 %v6165_v17  ;;  %v6249_v16 = vld [vmem:[#allocation7 + $0x51c] ss:$24 sps:$4 sm:$0xff]   ;;  %v6244_v17 = vld [vmem:[#allocation7 + $0x510] ss:$24 sps:$4 sm:$0xff]  }
 0x58e   :  { %4505 = vmatpush1.bf16.msra.mxu1 %v6160_v18  ;;  %v6247_v18 = vld [vmem:[#allocation7 + $0x518] ss:$24 sps:$4 sm:$0xff]  }
 0x58f   :  { %4628 = vmatpush1.bf16.msra.mxu0 %v6163_v19  ;;  %4506 = vmatprep.subr.bf16.mxu1 %v6168_v20  ;;  %v6252_v19 = vld [vmem:[#allocation7 + $0x544] ss:$24 sps:$4 sm:$0xff]  }
 0x590   :  { %4629 = vmatprep.subr.bf16.mxu0 %v6171_v21  ;;  %v6255_v20 = vld [vmem:[#allocation7 + $0x54c] ss:$24 sps:$4 sm:$0xff]   ;;  %v6250_v21 = vld [vmem:[#allocation7 + $0x540] ss:$24 sps:$4 sm:$0xff]  }
 0x592   :  { %4507 = vmatpush1.bf16.msra.mxu1 %v6166_v22  ;;  %v6253_v22 = vld [vmem:[#allocation7 + $0x548] ss:$24 sps:$4 sm:$0xff]  }
 0x593   :  { %4630 = vmatpush1.bf16.msra.mxu0 %v6169_v23  ;;  %4508 = vmatprep.subr.bf16.mxu1 %v6174_v37  ;;  %v6258_v23 = vld [vmem:[#allocation7 + $0x574] ss:$24 sps:$4 sm:$0xff]  }
 0x594   :  { %4631 = vmatprep.subr.bf16.mxu0 %v6177_v38  ;;  %v6261_v37 = vld [vmem:[#allocation7 + $0x57c] ss:$24 sps:$4 sm:$0xff]   ;;  %v6256_v38 = vld [vmem:[#allocation7 + $0x570] ss:$24 sps:$4 sm:$0xff]  }
 0x596   :  { %4509 = vmatpush1.bf16.msra.mxu1 %v6172_v42  ;;  %v6259_v42 = vld [vmem:[#allocation7 + $0x578] ss:$24 sps:$4 sm:$0xff]  }
 0x597   :  { %4632 = vmatpush1.bf16.msra.mxu0 %v6175_v43  ;;  %4519 = vmatprep.subr.bf16.mxu1 %v6180_v45  ;;  %v6264_v43 = vld [vmem:[#allocation7 + $0x5a4] ss:$24 sps:$4 sm:$0xff]  }
 0x598   :  { %4642 = vmatprep.subr.bf16.mxu0 %v6183_v47  ;;  %v6267_v45 = vld [vmem:[#allocation7 + $0x5ac] ss:$24 sps:$4 sm:$0xff]   ;;  %v6262_v47 = vld [vmem:[#allocation7 + $0x5a0] ss:$24 sps:$4 sm:$0xff]  }
 0x599   :  { %4511 = vmatmul.mubr.bf16.vlgmr.msra.gmra.mrb[12].mxu1 %v6879_v48 }
 0x59a   :  { %4520 = vmatpush1.bf16.msra.mxu1 %v6178_v50  ;;  %4634 = vmatmul.mubr.bf16.vlgmr.msra.gmra.mrb[8].mxu0 %v6879_v48  ;;  %v6265_v50 = vld [vmem:[#allocation7 + $0x5a8] ss:$24 sps:$4 sm:$0xff]  }
 0x59b   :  { %4643 = vmatpush1.bf16.msra.mxu0 %v6181_v14  ;;  %4521 = vmatprep.subr.bf16.mxu1 %v6186_v51  ;;  %v6270_v14 = vld [vmem:[#allocation7 + $0x5d4] ss:$24 sps:$4 sm:$0xff]  }
 0x59c   :  { %4644 = vmatprep.subr.bf16.mxu0 %v6189_v36  ;;  %4551 = vmatprep.mubr.bf16.mxu1 %v6885_v3  ;;  %v6273_v51 = vld [vmem:[#allocation7 + $0x5dc] ss:$24 sps:$4 sm:$0xff]   ;;  %v6268_v36 = vld [vmem:[#allocation7 + $0x5d0] ss:$24 sps:$4 sm:$0xff]  }
 0x59d   :  { %4674 = vmatprep.mubr.bf16.mxu0 %v6885_v3 }
 0x59e   :  { %4522 = vmatpush1.bf16.msra.mxu1 %v6184_v4  ;;  %v6271_v4 = vld [vmem:[#allocation7 + $0x5d8] ss:$24 sps:$4 sm:$0xff]  }
 0x59f   :  { %4645 = vmatpush1.bf16.msra.mxu0 %v6187_v9  ;;  %4523 = vmatprep.subr.bf16.mxu1 %v6192_v5  ;;  %v6276_v9 = vld [vmem:[#allocation7 + $0x604] ss:$24 sps:$4 sm:$0xff]  }
 0x5a0   :  { %4646 = vmatprep.subr.bf16.mxu0 %v6195_v6  ;;  %v6279_v5 = vld [vmem:[#allocation7 + $0x60c] ss:$24 sps:$4 sm:$0xff]  }
 0x5a1   :  { %v6891_v6 = vld [vmem:[#allocation2 + $0x10] sm:$0xff] }
 0x5a2   :  { %4524 = vmatpush1.bf16.msra.mxu1 %v6190_v8  ;;  %v6895_v8 = vpack.c.bf16 %v6891_v6, %v6891_v6 }
 0x5a3   :  { %4647 = vmatpush1.bf16.msra.mxu0 %v6193_v10  ;;  %4525 = vmatprep.subr.bf16.mxu1 %v6198_v24  ;;  %v6274_v10 = vld [vmem:[#allocation7 + $0x600] ss:$24 sps:$4 sm:$0xff]  }
 0x5a4   :  { %4648 = vmatprep.subr.bf16.mxu0 %v6201_v25  ;;  %v6277_v24 = vld [vmem:[#allocation7 + $0x608] ss:$24 sps:$4 sm:$0xff]   ;;  %v6282_v25 = vld [vmem:[#allocation7 + $0x634] ss:$24 sps:$4 sm:$0xff]  }
 0x5a6   :  { %4526 = vmatpush1.bf16.msra.mxu1 %v6196_v26  ;;  %v6285_v26 = vld [vmem:[#allocation7 + $0x63c] ss:$24 sps:$4 sm:$0xff]  }
 0x5a7   :  { %4649 = vmatpush1.bf16.msra.mxu0 %v6199_v27  ;;  %4527 = vmatprep.subr.bf16.mxu1 %v6204_v29  ;;  %v6897_v27 = vld [vmem:[#allocation2 + $0x28] sm:$0xff] }
 0x5a8   :  { %4650 = vmatprep.subr.bf16.mxu0 %v6207_v31  ;;  %v6901_v29 = vpack.c.bf16 %v6897_v27, %v6897_v27  ;;  %v6280_v31 = vld [vmem:[#allocation7 + $0x630] ss:$24 sps:$4 sm:$0xff]  }
 0x5aa   :  { %4528 = vmatpush1.bf16.msra.mxu1 %v6202_v32  ;;  %v6283_v32 = vld [vmem:[#allocation7 + $0x638] ss:$24 sps:$4 sm:$0xff]  }
 0x5ab   :  { %4651 = vmatpush1.bf16.msra.mxu0 %v6205_v33  ;;  %4529 = vmatprep.subr.bf16.mxu1 %v6210_v34  ;;  %v6288_v33 = vld [vmem:[#allocation7 + $0x664] ss:$24 sps:$4 sm:$0xff]  }
 0x5ac   :  { %4652 = vmatprep.subr.bf16.mxu0 %v6213_v35  ;;  %v6291_v34 = vld [vmem:[#allocation7 + $0x66c] ss:$24 sps:$4 sm:$0xff]   ;;  %v6286_v35 = vld [vmem:[#allocation7 + $0x660] ss:$24 sps:$4 sm:$0xff]  }
 0x5ae   :  { %4530 = vmatpush1.bf16.msra.mxu1 %v6208_v39  ;;  %v6289_v39 = vld [vmem:[#allocation7 + $0x668] ss:$24 sps:$4 sm:$0xff]  }
 0x5af   :  { %4653 = vmatpush1.bf16.msra.mxu0 %v6211_v40  ;;  %4531 = vmatprep.subr.bf16.mxu1 %v6216_v41  ;;  %v6294_v40 = vld [vmem:[#allocation7 + $0x694] ss:$24 sps:$4 sm:$0xff]  }
 0x5b0   :  { %4654 = vmatprep.subr.bf16.mxu0 %v6219_v44  ;;  %v6297_v41 = vld [vmem:[#allocation7 + $0x69c] ss:$24 sps:$4 sm:$0xff]   ;;  %v6292_v44 = vld [vmem:[#allocation7 + $0x690] ss:$24 sps:$4 sm:$0xff]  }
 0x5b2   :  { %4532 = vmatpush1.bf16.msra.mxu1 %v6214_v49  ;;  %v6295_v49 = vld [vmem:[#allocation7 + $0x698] ss:$24 sps:$4 sm:$0xff]  }
 0x5b3   :  { %4655 = vmatpush1.bf16.msra.mxu0 %v6217_v53  ;;  %4533 = vmatprep.subr.bf16.mxu1 %v6222_v54  ;;  %v6300_v53 = vld [vmem:[#allocation7 + $0x6c4] ss:$24 sps:$4 sm:$0xff]  }
 0x5b4   :  { %4656 = vmatprep.subr.bf16.mxu0 %v6225_v55  ;;  %v6303_v54 = vld [vmem:[#allocation7 + $0x6cc] ss:$24 sps:$4 sm:$0xff]   ;;  %v6298_v55 = vld [vmem:[#allocation7 + $0x6c0] ss:$24 sps:$4 sm:$0xff]  }
 0x5b6   :  { %4534 = vmatpush1.bf16.msra.mxu1 %v6220_v56  ;;  %v6301_v56 = vld [vmem:[#allocation7 + $0x6c8] ss:$24 sps:$4 sm:$0xff]  }
 0x5b7   :  { %4657 = vmatpush1.bf16.msra.mxu0 %v6223_v57  ;;  %4535 = vmatprep.subr.bf16.mxu1 %v6228_v58  ;;  %v6306_v57 = vld [vmem:[#allocation7 + $0x6f4] ss:$24 sps:$4 sm:$0xff]  }
 0x5b8   :  { %4658 = vmatprep.subr.bf16.mxu0 %v6231_v59  ;;  %v6309_v58 = vld [vmem:[#allocation7 + $0x6fc] ss:$24 sps:$4 sm:$0xff]   ;;  %v6304_v59 = vld [vmem:[#allocation7 + $0x6f0] ss:$24 sps:$4 sm:$0xff]  }
 0x5ba   :  { %4536 = vmatpush1.bf16.msra.mxu1 %v6226_v60  ;;  %v6307_v60 = vld [vmem:[#allocation7 + $0x6f8] ss:$24 sps:$4 sm:$0xff]  }
 0x5bb   :  { %4659 = vmatpush1.bf16.msra.mxu0 %v6229_v61  ;;  %4537 = vmatprep.subr.bf16.mxu1 %v6234_v62  ;;  %v6312_v61 = vld [vmem:[#allocation7 + $0x724] ss:$24 sps:$4 sm:$0xff]  }
 0x5bc   :  { %4660 = vmatprep.subr.bf16.mxu0 %v6237_v63  ;;  %v6315_v62 = vld [vmem:[#allocation7 + $0x72c] ss:$24 sps:$4 sm:$0xff]   ;;  %v6310_v63 = vld [vmem:[#allocation7 + $0x720] ss:$24 sps:$4 sm:$0xff]  }
 0x5be   :  { %4538 = vmatpush1.bf16.msra.mxu1 %v6232_v0  ;;  %v6313_v0 = vld [vmem:[#allocation7 + $0x728] ss:$24 sps:$4 sm:$0xff]  }
 0x5bf   :  { %4661 = vmatpush1.bf16.msra.mxu0 %v6235_v1  ;;  %4539 = vmatprep.subr.bf16.mxu1 %v6240_v2  ;;  %v6318_v1 = vld [vmem:[#allocation7 + $0x754] ss:$24 sps:$4 sm:$0xff]  }
 0x5c0   :  { %4662 = vmatprep.subr.bf16.mxu0 %v6243_v7  ;;  %v6321_v2 = vld [vmem:[#allocation7 + $0x75c] ss:$24 sps:$4 sm:$0xff]   ;;  %v6316_v7 = vld [vmem:[#allocation7 + $0x750] ss:$24 sps:$4 sm:$0xff]  }
 0x5c2   :  { %4540 = vmatpush1.bf16.msra.mxu1 %v6238_v11  ;;  %v6319_v11 = vld [vmem:[#allocation7 + $0x758] ss:$24 sps:$4 sm:$0xff]  }
 0x5c3   :  { %4663 = vmatpush1.bf16.msra.mxu0 %v6241_v12  ;;  %4541 = vmatprep.subr.bf16.mxu1 %v6246_v13  ;;  %v6324_v12 = vld [vmem:[#allocation7 + $0x784] ss:$24 sps:$4 sm:$0xff]  }
 0x5c4   :  { %4664 = vmatprep.subr.bf16.mxu0 %v6249_v16  ;;  %v6327_v13 = vld [vmem:[#allocation7 + $0x78c] ss:$24 sps:$4 sm:$0xff]   ;;  %v6322_v16 = vld [vmem:[#allocation7 + $0x780] ss:$24 sps:$4 sm:$0xff]  }
 0x5c6   :  { %4542 = vmatpush1.bf16.msra.mxu1 %v6244_v17  ;;  %v6325_v17 = vld [vmem:[#allocation7 + $0x788] ss:$24 sps:$4 sm:$0xff]  }
 0x5c7   :  { %4665 = vmatpush1.bf16.msra.mxu0 %v6247_v18  ;;  %4543 = vmatprep.subr.bf16.mxu1 %v6252_v19  ;;  %v6330_v18 = vld [vmem:[#allocation7 + $0x7b4] ss:$24 sps:$4 sm:$0xff]  }
 0x5c8   :  { %4666 = vmatprep.subr.bf16.mxu0 %v6255_v20  ;;  %v6333_v19 = vld [vmem:[#allocation7 + $0x7bc] ss:$24 sps:$4 sm:$0xff]   ;;  %v6328_v20 = vld [vmem:[#allocation7 + $0x7b0] ss:$24 sps:$4 sm:$0xff]  }
 0x5ca   :  { %4544 = vmatpush1.bf16.msra.mxu1 %v6250_v21  ;;  %v6331_v21 = vld [vmem:[#allocation7 + $0x7b8] ss:$24 sps:$4 sm:$0xff]  }
 0x5cb   :  { %4667 = vmatpush1.bf16.msra.mxu0 %v6253_v22  ;;  %4545 = vmatprep.subr.bf16.mxu1 %v6258_v23  ;;  %v6336_v22 = vld [vmem:[#allocation7 + $0x7e4] ss:$24 sps:$4 sm:$0xff]  }
 0x5cc   :  { %4668 = vmatprep.subr.bf16.mxu0 %v6261_v37  ;;  %v6339_v23 = vld [vmem:[#allocation7 + $0x7ec] ss:$24 sps:$4 sm:$0xff]   ;;  %v6334_v37 = vld [vmem:[#allocation7 + $0x7e0] ss:$24 sps:$4 sm:$0xff]  }
 0x5ce   :  { %4546 = vmatpush1.bf16.msra.mxu1 %v6256_v38  ;;  %v6337_v38 = vld [vmem:[#allocation7 + $0x7e8] ss:$24 sps:$4 sm:$0xff]  }
 0x5cf   :  { %4669 = vmatpush1.bf16.msra.mxu0 %v6259_v42  ;;  %4547 = vmatprep.subr.bf16.mxu1 %v6264_v43  ;;  %v6342_v42 = vld [vmem:[#allocation7 + $0x814] ss:$24 sps:$4 sm:$0xff]  }
 0x5d0   :  { %4670 = vmatprep.subr.bf16.mxu0 %v6267_v45  ;;  %v6345_v43 = vld [vmem:[#allocation7 + $0x81c] ss:$24 sps:$4 sm:$0xff]   ;;  %v6340_v45 = vld [vmem:[#allocation7 + $0x810] ss:$24 sps:$4 sm:$0xff]  }
 0x5d2   :  { %4548 = vmatpush1.bf16.msra.mxu1 %v6262_v47  ;;  %v6343_v47 = vld [vmem:[#allocation7 + $0x818] ss:$24 sps:$4 sm:$0xff]  }
 0x5d3   :  { %4671 = vmatpush1.bf16.msra.mxu0 %v6265_v50  ;;  %4549 = vmatprep.subr.bf16.mxu1 %v6270_v14  ;;  %v6348_v50 = vld [vmem:[#allocation7 + $0x844] ss:$24 sps:$4 sm:$0xff]  }
 0x5d4   :  { %4672 = vmatprep.subr.bf16.mxu0 %v6273_v51  ;;  %v6351_v14 = vld [vmem:[#allocation7 + $0x84c] ss:$24 sps:$4 sm:$0xff]   ;;  %v6346_v51 = vld [vmem:[#allocation7 + $0x840] ss:$24 sps:$4 sm:$0xff]  }
 0x5d6   :  { %4550 = vmatpush1.bf16.msra.mxu1 %v6268_v36  ;;  %v6349_v36 = vld [vmem:[#allocation7 + $0x848] ss:$24 sps:$4 sm:$0xff]  }
 0x5d7   :  { %4673 = vmatpush1.bf16.msra.mxu0 %v6271_v4  ;;  %4560 = vmatprep.subr.bf16.mxu1 %v6276_v9  ;;  %v6354_v4 = vld [vmem:[#allocation7 + $0x874] ss:$24 sps:$4 sm:$0xff]  }
 0x5d8   :  { %4683 = vmatprep.subr.bf16.mxu0 %v6279_v5  ;;  %v6357_v9 = vld [vmem:[#allocation7 + $0x87c] ss:$24 sps:$4 sm:$0xff]   ;;  %v6352_v5 = vld [vmem:[#allocation7 + $0x870] ss:$24 sps:$4 sm:$0xff]  }
 0x5d9   :  { %4552 = vmatmul.mubr.bf16.vlgmr.msra.gmra.mrb[12].mxu1 %v6895_v8 }
 0x5da   :  { %4561 = vmatpush1.bf16.msra.mxu1 %v6274_v10  ;;  %4675 = vmatmul.mubr.bf16.vlgmr.msra.gmra.mrb[8].mxu0 %v6895_v8  ;;  %v6355_v10 = vld [vmem:[#allocation7 + $0x878] ss:$24 sps:$4 sm:$0xff]  }
 0x5db   :  { %4684 = vmatpush1.bf16.msra.mxu0 %v6277_v24  ;;  %4562 = vmatprep.subr.bf16.mxu1 %v6282_v25  ;;  %v6360_v24 = vld [vmem:[#allocation7 + $0x8a4] ss:$24 sps:$4 sm:$0xff]  }
 0x5dc   :  { %4685 = vmatprep.subr.bf16.mxu0 %v6285_v26  ;;  %4592 = vmatprep.mubr.bf16.mxu1 %v6901_v29  ;;  %v6363_v25 = vld [vmem:[#allocation7 + $0x8ac] ss:$24 sps:$4 sm:$0xff]   ;;  %v6358_v26 = vld [vmem:[#allocation7 + $0x8a0] ss:$24 sps:$4 sm:$0xff]  }
 0x5dd   :  { %4715 = vmatprep.mubr.bf16.mxu0 %v6901_v29 }
 0x5de   :  { %4563 = vmatpush1.bf16.msra.mxu1 %v6280_v31  ;;  %v6361_v31 = vld [vmem:[#allocation7 + $0x8a8] ss:$24 sps:$4 sm:$0xff]  }
 0x5df   :  { %4686 = vmatpush1.bf16.msra.mxu0 %v6283_v32  ;;  %4564 = vmatprep.subr.bf16.mxu1 %v6288_v33  ;;  %v6366_v32 = vld [vmem:[#allocation7 + $0x8d4] ss:$24 sps:$4 sm:$0xff]  }
 0x5e0   :  { %4687 = vmatprep.subr.bf16.mxu0 %v6291_v34  ;;  %v6369_v33 = vld [vmem:[#allocation7 + $0x8dc] ss:$24 sps:$4 sm:$0xff]   ;;  %v6364_v34 = vld [vmem:[#allocation7 + $0x8d0] ss:$24 sps:$4 sm:$0xff]  }
 0x5e2   :  { %4565 = vmatpush1.bf16.msra.mxu1 %v6286_v35  ;;  %v6367_v35 = vld [vmem:[#allocation7 + $0x8d8] ss:$24 sps:$4 sm:$0xff]  }
 0x5e3   :  { %4688 = vmatpush1.bf16.msra.mxu0 %v6289_v39  ;;  %4566 = vmatprep.subr.bf16.mxu1 %v6294_v40  ;;  %v6372_v39 = vld [vmem:[#allocation7 + $0x14] ss:$24 sps:$4 sm:$0xff]  }
 0x5e4   :  { %4689 = vmatprep.subr.bf16.mxu0 %v6297_v41  ;;  %v6907_v40 = vld [vmem:[#allocation2 + $0x20] sm:$0xff] }
 0x5e5   :  { %v6911_v41 = vpack.c.bf16 %v6907_v40, %v6907_v40 }
 0x5e6   :  { %4567 = vmatpush1.bf16.msra.mxu1 %v6292_v44  ;;  %v6370_v44 = vld [vmem:[#allocation7 + $0x10] ss:$24 sps:$4 sm:$0xff]  }
 0x5e7   :  { %4690 = vmatpush1.bf16.msra.mxu0 %v6295_v49  ;;  %4568 = vmatprep.subr.bf16.mxu1 %v6300_v53  ;;  %v6375_v49 = vld [vmem:[#allocation7 + $0x44] ss:$24 sps:$4 sm:$0xff]   ;;  %v6373_v53 = vld [vmem:[#allocation7 + $0x40] ss:$24 sps:$4 sm:$0xff]  }
 0x5e8   :  { %4691 = vmatprep.subr.bf16.mxu0 %v6303_v54  ;;  %v6378_v54 = vld [vmem:[#allocation7 + $0x74] ss:$24 sps:$4 sm:$0xff]  }
 0x5ea   :  { %4569 = vmatpush1.bf16.msra.mxu1 %v6298_v55  ;;  %v6376_v55 = vld [vmem:[#allocation7 + $0x70] ss:$24 sps:$4 sm:$0xff]  }
 0x5eb   :  { %4692 = vmatpush1.bf16.msra.mxu0 %v6301_v56  ;;  %4570 = vmatprep.subr.bf16.mxu1 %v6306_v57  ;;  %v6381_v56 = vld [vmem:[#allocation7 + $0xa4] ss:$24 sps:$4 sm:$0xff]   ;;  %v6379_v57 = vld [vmem:[#allocation7 + $0xa0] ss:$24 sps:$4 sm:$0xff]  }
 0x5ec   :  { %4693 = vmatprep.subr.bf16.mxu0 %v6309_v58  ;;  %v6384_v58 = vld [vmem:[#allocation7 + $0xd4] ss:$24 sps:$4 sm:$0xff]  }
 0x5ee   :  { %4571 = vmatpush1.bf16.msra.mxu1 %v6304_v59  ;;  %v6382_v59 = vld [vmem:[#allocation7 + $0xd0] ss:$24 sps:$4 sm:$0xff]  }
 0x5ef   :  { %4694 = vmatpush1.bf16.msra.mxu0 %v6307_v60  ;;  %4572 = vmatprep.subr.bf16.mxu1 %v6312_v61  ;;  %v6387_v60 = vld [vmem:[#allocation7 + $0x104] ss:$24 sps:$4 sm:$0xff]   ;;  %v6385_v61 = vld [vmem:[#allocation7 + $0x100] ss:$24 sps:$4 sm:$0xff]  }
 0x5f0   :  { %4695 = vmatprep.subr.bf16.mxu0 %v6315_v62  ;;  %v6390_v62 = vld [vmem:[#allocation7 + $0x134] ss:$24 sps:$4 sm:$0xff]  }
 0x5f2   :  { %4573 = vmatpush1.bf16.msra.mxu1 %v6310_v63  ;;  %v6388_v63 = vld [vmem:[#allocation7 + $0x130] ss:$24 sps:$4 sm:$0xff]  }
 0x5f3   :  { %4696 = vmatpush1.bf16.msra.mxu0 %v6313_v0  ;;  %4574 = vmatprep.subr.bf16.mxu1 %v6318_v1  ;;  %v6391_v0 = vld [vmem:[#allocation7 + $0x160] ss:$24 sps:$4 sm:$0xff]   ;;  %v6396_v1 = vld [vmem:[#allocation7 + $0x194] ss:$24 sps:$4 sm:$0xff]  }
 0x5f4   :  { %4697 = vmatprep.subr.bf16.mxu0 %v6321_v2  ;;  %v6394_v2 = vld [vmem:[#allocation7 + $0x190] ss:$24 sps:$4 sm:$0xff]  }
 0x5f6   :  { %4575 = vmatpush1.bf16.msra.mxu1 %v6316_v7  ;;  %v6399_v7 = vld [vmem:[#allocation7 + $0x1c4] ss:$24 sps:$4 sm:$0xff]  }
 0x5f7   :  { %4698 = vmatpush1.bf16.msra.mxu0 %v6319_v11  ;;  %4576 = vmatprep.subr.bf16.mxu1 %v6324_v12  ;;  %v6397_v11 = vld [vmem:[#allocation7 + $0x1c0] ss:$24 sps:$4 sm:$0xff]   ;;  %v6402_v12 = vld [vmem:[#allocation7 + $0x1f4] ss:$24 sps:$4 sm:$0xff]  }
 0x5f8   :  { %4699 = vmatprep.subr.bf16.mxu0 %v6327_v13  ;;  %v6400_v13 = vld [vmem:[#allocation7 + $0x1f0] ss:$24 sps:$4 sm:$0xff]  }
 0x5fa   :  { %4577 = vmatpush1.bf16.msra.mxu1 %v6322_v16  ;;  %v6405_v16 = vld [vmem:[#allocation7 + $0x224] ss:$24 sps:$4 sm:$0xff]  }
 0x5fb   :  { %4700 = vmatpush1.bf16.msra.mxu0 %v6325_v17  ;;  %4578 = vmatprep.subr.bf16.mxu1 %v6330_v18  ;;  %v6403_v17 = vld [vmem:[#allocation7 + $0x220] ss:$24 sps:$4 sm:$0xff]   ;;  %v6408_v18 = vld [vmem:[#allocation7 + $0x254] ss:$24 sps:$4 sm:$0xff]  }
 0x5fc   :  { %4701 = vmatprep.subr.bf16.mxu0 %v6333_v19  ;;  %v6406_v19 = vld [vmem:[#allocation7 + $0x250] ss:$24 sps:$4 sm:$0xff]  }
 0x5fe   :  { %4579 = vmatpush1.bf16.msra.mxu1 %v6328_v20  ;;  %v6411_v20 = vld [vmem:[#allocation7 + $0x284] ss:$24 sps:$4 sm:$0xff]  }
 0x5ff   :  { %4702 = vmatpush1.bf16.msra.mxu0 %v6331_v21  ;;  %4580 = vmatprep.subr.bf16.mxu1 %v6336_v22  ;;  %v6409_v21 = vld [vmem:[#allocation7 + $0x280] ss:$24 sps:$4 sm:$0xff]   ;;  %v6414_v22 = vld [vmem:[#allocation7 + $0x2b4] ss:$24 sps:$4 sm:$0xff]  }
 0x600   :  { %4703 = vmatprep.subr.bf16.mxu0 %v6339_v23  ;;  %v6412_v23 = vld [vmem:[#allocation7 + $0x2b0] ss:$24 sps:$4 sm:$0xff]  }
 0x602   :  { %4581 = vmatpush1.bf16.msra.mxu1 %v6334_v37  ;;  %v6417_v37 = vld [vmem:[#allocation7 + $0x2e4] ss:$24 sps:$4 sm:$0xff]  }
 0x603   :  { %4704 = vmatpush1.bf16.msra.mxu0 %v6337_v38  ;;  %4582 = vmatprep.subr.bf16.mxu1 %v6342_v42  ;;  %v6415_v38 = vld [vmem:[#allocation7 + $0x2e0] ss:$24 sps:$4 sm:$0xff]   ;;  %v6420_v42 = vld [vmem:[#allocation7 + $0x314] ss:$24 sps:$4 sm:$0xff]  }
 0x604   :  { %4705 = vmatprep.subr.bf16.mxu0 %v6345_v43  ;;  %v6418_v43 = vld [vmem:[#allocation7 + $0x310] ss:$24 sps:$4 sm:$0xff]  }
 0x606   :  { %4583 = vmatpush1.bf16.msra.mxu1 %v6340_v45  ;;  %v6423_v45 = vld [vmem:[#allocation7 + $0x344] ss:$24 sps:$4 sm:$0xff]  }
 0x607   :  { %4706 = vmatpush1.bf16.msra.mxu0 %v6343_v47  ;;  %4584 = vmatprep.subr.bf16.mxu1 %v6348_v50  ;;  %v6421_v47 = vld [vmem:[#allocation7 + $0x340] ss:$24 sps:$4 sm:$0xff]   ;;  %v6426_v50 = vld [vmem:[#allocation7 + $0x374] ss:$24 sps:$4 sm:$0xff]  }
 0x608   :  { %4707 = vmatprep.subr.bf16.mxu0 %v6351_v14  ;;  %v6424_v14 = vld [vmem:[#allocation7 + $0x370] ss:$24 sps:$4 sm:$0xff]  }
 0x60a   :  { %4585 = vmatpush1.bf16.msra.mxu1 %v6346_v51  ;;  %v6429_v51 = vld [vmem:[#allocation7 + $0x3a4] ss:$24 sps:$4 sm:$0xff]  }
 0x60b   :  { %4708 = vmatpush1.bf16.msra.mxu0 %v6349_v36  ;;  %4586 = vmatprep.subr.bf16.mxu1 %v6354_v4  ;;  %v6427_v36 = vld [vmem:[#allocation7 + $0x3a0] ss:$24 sps:$4 sm:$0xff]   ;;  %v6432_v4 = vld [vmem:[#allocation7 + $0x3d4] ss:$24 sps:$4 sm:$0xff]  }
 0x60c   :  { %4709 = vmatprep.subr.bf16.mxu0 %v6357_v9  ;;  %v6430_v9 = vld [vmem:[#allocation7 + $0x3d0] ss:$24 sps:$4 sm:$0xff]  }
 0x60e   :  { %4587 = vmatpush1.bf16.msra.mxu1 %v6352_v5  ;;  %v6435_v5 = vld [vmem:[#allocation7 + $0x404] ss:$24 sps:$4 sm:$0xff]  }
 0x60f   :  { %4710 = vmatpush1.bf16.msra.mxu0 %v6355_v10  ;;  %4588 = vmatprep.subr.bf16.mxu1 %v6360_v24  ;;  %v6438_v10 = vld [vmem:[#allocation7 + $0x434] ss:$24 sps:$4 sm:$0xff]   ;;  %v6441_v24 = vld [vmem:[#allocation7 + $0x464] ss:$24 sps:$4 sm:$0xff]  }
 0x610   :  { %4711 = vmatprep.subr.bf16.mxu0 %v6363_v25  ;;  %v6439_v25 = vld [vmem:[#allocation7 + $0x460] ss:$24 sps:$4 sm:$0xff]  }
 0x612   :  { %4589 = vmatpush1.bf16.msra.mxu1 %v6358_v26  ;;  %v6444_v26 = vld [vmem:[#allocation7 + $0x494] ss:$24 sps:$4 sm:$0xff]  }
 0x613   :  { %4712 = vmatpush1.bf16.msra.mxu0 %v6361_v31  ;;  %4590 = vmatprep.subr.bf16.mxu1 %v6366_v32  ;;  %v6442_v31 = vld [vmem:[#allocation7 + $0x490] ss:$24 sps:$4 sm:$0xff]   ;;  %v6447_v32 = vld [vmem:[#allocation7 + $0x4c4] ss:$24 sps:$4 sm:$0xff]  }
 0x614   :  { %4713 = vmatprep.subr.bf16.mxu0 %v6369_v33  ;;  %v6445_v33 = vld [vmem:[#allocation7 + $0x4c0] ss:$24 sps:$4 sm:$0xff]  }
 0x616   :  { %4591 = vmatpush1.bf16.msra.mxu1 %v6364_v34  ;;  %v6450_v34 = vld [vmem:[#allocation7 + $0x4f4] ss:$24 sps:$4 sm:$0xff]  }
 0x617   :  { %4714 = vmatpush1.bf16.msra.mxu0 %v6367_v35  ;;  %4724 = vmatprep.subr.bf16.mxu1 %v6372_v39  ;;  %v6448_v35 = vld [vmem:[#allocation7 + $0x4f0] ss:$24 sps:$4 sm:$0xff]   ;;  %v6453_v39 = vld [vmem:[#allocation7 + $0x524] ss:$24 sps:$4 sm:$0xff]  }
 0x619   :  { %4593 = vmatmul.mubr.bf16.vlgmr.msra.gmra.mrb[12].mxu1 %v6911_v41 }
 0x61a   :  { %4716 = vmatmul.mubr.bf16.vlgmr.msra.gmra.mrb[8].mxu0 %v6911_v41  ;;  %4725 = vmatpush1.bf16.msra.mxu1 %v6370_v44  ;;  %v6451_v44 = vld [vmem:[#allocation7 + $0x520] ss:$24 sps:$4 sm:$0xff]  }
 0x61b   :  { %4726 = vmatprep.subr.bf16.mxu1 %v6375_v49  ;;  %4756 = vmatprep.mubr.bf16.mxu1 %v6865_v46  ;;  %v6393_v46 = vld [vmem:[#allocation7 + $0x164] ss:$24 sps:$4 sm:$0xff]   ;;  %v6456_v49 = vld [vmem:[#allocation7 + $0x554] ss:$24 sps:$4 sm:$0xff]  }
 0x61e   :  { %4727 = vmatpush1.bf16.msra.mxu1 %v6373_v53  ;;  %v6454_v53 = vld [vmem:[#allocation7 + $0x550] ss:$24 sps:$4 sm:$0xff]  }
 0x61f   :  { %4728 = vmatprep.subr.bf16.mxu1 %v6378_v54  ;;  %v6459_v54 = vld [vmem:[#allocation7 + $0x584] ss:$24 sps:$4 sm:$0xff]  }
 0x622   :  { %4729 = vmatpush1.bf16.msra.mxu1 %v6376_v55  ;;  %v6457_v55 = vld [vmem:[#allocation7 + $0x580] ss:$24 sps:$4 sm:$0xff]  }
 0x623   :  { %4730 = vmatprep.subr.bf16.mxu1 %v6381_v56  ;;  %v6462_v56 = vld [vmem:[#allocation7 + $0x5b4] ss:$24 sps:$4 sm:$0xff]  }
 0x626   :  { %4731 = vmatpush1.bf16.msra.mxu1 %v6379_v57  ;;  %v6460_v57 = vld [vmem:[#allocation7 + $0x5b0] ss:$24 sps:$4 sm:$0xff]  }
 0x627   :  { %4732 = vmatprep.subr.bf16.mxu1 %v6384_v58  ;;  %v6465_v58 = vld [vmem:[#allocation7 + $0x5e4] ss:$24 sps:$4 sm:$0xff]  }
 0x62a   :  { %4733 = vmatpush1.bf16.msra.mxu1 %v6382_v59  ;;  %v6463_v59 = vld [vmem:[#allocation7 + $0x5e0] ss:$24 sps:$4 sm:$0xff]  }
 0x62b   :  { %4734 = vmatprep.subr.bf16.mxu1 %v6387_v60  ;;  %v6468_v60 = vld [vmem:[#allocation7 + $0x614] ss:$24 sps:$4 sm:$0xff]  }
 0x62e   :  { %4735 = vmatpush1.bf16.msra.mxu1 %v6385_v61  ;;  %v6466_v61 = vld [vmem:[#allocation7 + $0x610] ss:$24 sps:$4 sm:$0xff]  }
 0x62f   :  { %4736 = vmatprep.subr.bf16.mxu1 %v6390_v62  ;;  %v6471_v62 = vld [vmem:[#allocation7 + $0x644] ss:$24 sps:$4 sm:$0xff]  }
 0x632   :  { %4737 = vmatpush1.bf16.msra.mxu1 %v6388_v63  ;;  %v6469_v63 = vld [vmem:[#allocation7 + $0x640] ss:$24 sps:$4 sm:$0xff]  }
 0x633   :  { %4738 = vmatprep.subr.bf16.mxu1 %v6393_v46  ;;  %v6474_v46 = vld [vmem:[#allocation7 + $0x674] ss:$24 sps:$4 sm:$0xff]  }
 0x636   :  { %4739 = vmatpush1.bf16.msra.mxu1 %v6391_v0  ;;  %v6472_v0 = vld [vmem:[#allocation7 + $0x670] ss:$24 sps:$4 sm:$0xff]  }
 0x637   :  { %4740 = vmatprep.subr.bf16.mxu1 %v6396_v1  ;;  %v6477_v1 = vld [vmem:[#allocation7 + $0x6a4] ss:$24 sps:$4 sm:$0xff]  }
 0x63a   :  { %4741 = vmatpush1.bf16.msra.mxu1 %v6394_v2  ;;  %v6475_v2 = vld [vmem:[#allocation7 + $0x6a0] ss:$24 sps:$4 sm:$0xff]  }
 0x63b   :  { %4742 = vmatprep.subr.bf16.mxu1 %v6399_v7  ;;  %v6480_v7 = vld [vmem:[#allocation7 + $0x6d4] ss:$24 sps:$4 sm:$0xff]  }
 0x63e   :  { %4743 = vmatpush1.bf16.msra.mxu1 %v6397_v11  ;;  %v6478_v11 = vld [vmem:[#allocation7 + $0x6d0] ss:$24 sps:$4 sm:$0xff]  }
 0x63f   :  { %4744 = vmatprep.subr.bf16.mxu1 %v6402_v12  ;;  %v6483_v12 = vld [vmem:[#allocation7 + $0x704] ss:$24 sps:$4 sm:$0xff]  }
 0x642   :  { %4745 = vmatpush1.bf16.msra.mxu1 %v6400_v13  ;;  %v6486_v13 = vld [vmem:[#allocation7 + $0x734] ss:$24 sps:$4 sm:$0xff]  }
 0x643   :  { %4746 = vmatprep.subr.bf16.mxu1 %v6405_v16  ;;  %v6489_v16 = vld [vmem:[#allocation7 + $0x764] ss:$24 sps:$4 sm:$0xff]  }
 0x646   :  { %4747 = vmatpush1.bf16.msra.mxu1 %v6403_v17  ;;  %v6487_v17 = vld [vmem:[#allocation7 + $0x760] ss:$24 sps:$4 sm:$0xff]  }
 0x647   :  { %4748 = vmatprep.subr.bf16.mxu1 %v6408_v18  ;;  %v6492_v18 = vld [vmem:[#allocation7 + $0x794] ss:$24 sps:$4 sm:$0xff]  }
 0x64a   :  { %4749 = vmatpush1.bf16.msra.mxu1 %v6406_v19  ;;  %v6490_v19 = vld [vmem:[#allocation7 + $0x790] ss:$24 sps:$4 sm:$0xff]  }
 0x64b   :  { %4750 = vmatprep.subr.bf16.mxu1 %v6411_v20  ;;  %v6495_v20 = vld [vmem:[#allocation7 + $0x7c4] ss:$24 sps:$4 sm:$0xff]  }
 0x64e   :  { %4751 = vmatpush1.bf16.msra.mxu1 %v6409_v21  ;;  %v6493_v21 = vld [vmem:[#allocation7 + $0x7c0] ss:$24 sps:$4 sm:$0xff]  }
 0x64f   :  { %4752 = vmatprep.subr.bf16.mxu1 %v6414_v22  ;;  %v6498_v22 = vld [vmem:[#allocation7 + $0x7f4] ss:$24 sps:$4 sm:$0xff]  }
 0x652   :  { %4753 = vmatpush1.bf16.msra.mxu1 %v6412_v23  ;;  %v6496_v23 = vld [vmem:[#allocation7 + $0x7f0] ss:$24 sps:$4 sm:$0xff]  }
 0x653   :  { %4754 = vmatprep.subr.bf16.mxu1 %v6417_v37  ;;  %v6501_v37 = vld [vmem:[#allocation7 + $0x824] ss:$24 sps:$4 sm:$0xff]  }
 0x656   :  { %4755 = vmatpush1.bf16.msra.mxu1 %v6415_v38  ;;  %v6499_v38 = vld [vmem:[#allocation7 + $0x820] ss:$24 sps:$4 sm:$0xff]  }
 0x657   :  { %4765 = vmatprep.subr.bf16.mxu1 %v6420_v42  ;;  %v6504_v42 = vld [vmem:[#allocation7 + $0x854] ss:$24 sps:$4 sm:$0xff]  }
 0x659   :  { %4757 = vmatmul.mubr.bf16.vlgmr.msra.gmra.mrb[16].mxu1 %v6879_v48  ;;  %v6433_v48 = vld [vmem:[#allocation7 + $0x400] ss:$24 sps:$4 sm:$0xff]  }
 0x65a   :  { %4766 = vmatpush1.bf16.msra.mxu1 %v6418_v43  ;;  %4797 = vmatprep.mubr.bf16.mxu1 %v6885_v3  ;;  %v6436_v3 = vld [vmem:[#allocation7 + $0x430] ss:$24 sps:$4 sm:$0xff]  }
 0x65b   :  { %4767 = vmatprep.subr.bf16.mxu1 %v6423_v45  ;;  %v6502_v43 = vld [vmem:[#allocation7 + $0x850] ss:$24 sps:$4 sm:$0xff]   ;;  %v6507_v45 = vld [vmem:[#allocation7 + $0x884] ss:$24 sps:$4 sm:$0xff]  }
 0x65e   :  { %4768 = vmatpush1.bf16.msra.mxu1 %v6421_v47  ;;  %v6505_v47 = vld [vmem:[#allocation7 + $0x880] ss:$24 sps:$4 sm:$0xff]  }
 0x65f   :  { %4769 = vmatprep.subr.bf16.mxu1 %v6426_v50  ;;  %v6510_v50 = vld [vmem:[#allocation7 + $0x8b4] ss:$24 sps:$4 sm:$0xff]  }
 0x662   :  { %4770 = vmatpush1.bf16.msra.mxu1 %v6424_v14  ;;  %v6508_v14 = vld [vmem:[#allocation7 + $0x8b0] ss:$24 sps:$4 sm:$0xff]  }
 0x663   :  { %4771 = vmatprep.subr.bf16.mxu1 %v6429_v51  ;;  %v6513_v51 = vld [vmem:[#allocation7 + $0x8e4] ss:$24 sps:$4 sm:$0xff]  }
 0x666   :  { %4772 = vmatpush1.bf16.msra.mxu1 %v6427_v36  ;;  %v6511_v36 = vld [vmem:[#allocation7 + $0x8e0] ss:$24 sps:$4 sm:$0xff]  }
 0x667   :  { %4773 = vmatprep.subr.bf16.mxu1 %v6432_v4 }
 0x66a   :  { %4774 = vmatpush1.bf16.msra.mxu1 %v6430_v9 }
 0x66b   :  { %4775 = vmatprep.subr.bf16.mxu1 %v6435_v5 }
 0x66e   :  { %4776 = vmatpush1.bf16.msra.mxu1 %v6433_v48 }
 0x66f   :  { %4777 = vmatprep.subr.bf16.mxu1 %v6438_v10 }
 0x672   :  { %4778 = vmatpush1.bf16.msra.mxu1 %v6436_v3 }
 0x673   :  { %4779 = vmatprep.subr.bf16.mxu1 %v6441_v24 }
 0x676   :  { %4780 = vmatpush1.bf16.msra.mxu1 %v6439_v25 }
 0x677   :  { %4781 = vmatprep.subr.bf16.mxu1 %v6444_v26 }
 0x67a   :  { %4782 = vmatpush1.bf16.msra.mxu1 %v6442_v31 }
 0x67b   :  { %4783 = vmatprep.subr.bf16.mxu1 %v6447_v32 }
 0x67e   :  { %4784 = vmatpush1.bf16.msra.mxu1 %v6445_v33 }
 0x67f   :  { %4785 = vmatprep.subr.bf16.mxu1 %v6450_v34 }
 0x682   :  { %4786 = vmatpush1.bf16.msra.mxu1 %v6448_v35 }
 0x683   :  { %4787 = vmatprep.subr.bf16.mxu1 %v6453_v39 }
 0x686   :  { %4788 = vmatpush1.bf16.msra.mxu1 %v6451_v44 }
 0x687   :  { %4789 = vmatprep.subr.bf16.mxu1 %v6456_v49 }
 0x68a   :  { %4790 = vmatpush1.bf16.msra.mxu1 %v6454_v53 }
 0x68b   :  { %4791 = vmatprep.subr.bf16.mxu1 %v6459_v54 }
 0x68e   :  { %4792 = vmatpush1.bf16.msra.mxu1 %v6457_v55 }
 0x68f   :  { %4793 = vmatprep.subr.bf16.mxu1 %v6462_v56 }
 0x692   :  { %4794 = vmatpush1.bf16.msra.mxu1 %v6460_v57 }
 0x693   :  { %4795 = vmatprep.subr.bf16.mxu1 %v6465_v58 }
 0x696   :  { %4796 = vmatpush1.bf16.msra.mxu1 %v6463_v59 }
 0x697   :  { %4806 = vmatprep.subr.bf16.mxu1 %v6468_v60 }
 0x699   :  { %4798 = vmatmul.mubr.bf16.vlgmr.msra.gmra.mrb[16].mxu1 %v6895_v8  ;;  %v6481_v8 = vld [vmem:[#allocation7 + $0x700] ss:$24 sps:$4 sm:$0xff]  }
 0x69a   :  { %4807 = vmatpush1.bf16.msra.mxu1 %v6466_v61  ;;  %4838 = vmatprep.mubr.bf16.mxu1 %v6901_v29  ;;  %v6484_v29 = vld [vmem:[#allocation7 + $0x730] ss:$24 sps:$4 sm:$0xff]  }
 0x69b   :  { %4808 = vmatprep.subr.bf16.mxu1 %v6471_v62 }
 0x69e   :  { %4809 = vmatpush1.bf16.msra.mxu1 %v6469_v63 }
 0x69f   :  { %4810 = vmatprep.subr.bf16.mxu1 %v6474_v46 }
 0x6a2   :  { %4811 = vmatpush1.bf16.msra.mxu1 %v6472_v0 }
 0x6a3   :  { %4812 = vmatprep.subr.bf16.mxu1 %v6477_v1 }
 0x6a6   :  { %4813 = vmatpush1.bf16.msra.mxu1 %v6475_v2 }
 0x6a7   :  { %4814 = vmatprep.subr.bf16.mxu1 %v6480_v7 }
 0x6aa   :  { %4815 = vmatpush1.bf16.msra.mxu1 %v6478_v11 }
 0x6ab   :  { %4816 = vmatprep.subr.bf16.mxu1 %v6483_v12 }
 0x6ae   :  { %4817 = vmatpush1.bf16.msra.mxu1 %v6481_v8 }
 0x6af   :  { %4818 = vmatprep.subr.bf16.mxu1 %v6486_v13 }
 0x6b2   :  { %4819 = vmatpush1.bf16.msra.mxu1 %v6484_v29 }
 0x6b3   :  { %4820 = vmatprep.subr.bf16.mxu1 %v6489_v16 }
 0x6b6   :  { %4821 = vmatpush1.bf16.msra.mxu1 %v6487_v17 }
 0x6b7   :  { %4822 = vmatprep.subr.bf16.mxu1 %v6492_v18 }
 0x6ba   :  { %4823 = vmatpush1.bf16.msra.mxu1 %v6490_v19 }
 0x6bb   :  { %4824 = vmatprep.subr.bf16.mxu1 %v6495_v20 }
 0x6be   :  { %4825 = vmatpush1.bf16.msra.mxu1 %v6493_v21 }
 0x6bf   :  { %4826 = vmatprep.subr.bf16.mxu1 %v6498_v22 }
 0x6c2   :  { %4827 = vmatpush1.bf16.msra.mxu1 %v6496_v23 }
 0x6c3   :  { %4828 = vmatprep.subr.bf16.mxu1 %v6501_v37 }
 0x6c6   :  { %4829 = vmatpush1.bf16.msra.mxu1 %v6499_v38 }
 0x6c7   :  { %4830 = vmatprep.subr.bf16.mxu1 %v6504_v42 }
 0x6ca   :  { %4831 = vmatpush1.bf16.msra.mxu1 %v6502_v43 }
 0x6cb   :  { %4832 = vmatprep.subr.bf16.mxu1 %v6507_v45 }
 0x6ce   :  { %4833 = vmatpush1.bf16.msra.mxu1 %v6505_v47 }
 0x6cf   :  { %4834 = vmatprep.subr.bf16.mxu1 %v6510_v50 }
 0x6d2   :  { %4835 = vmatpush1.bf16.msra.mxu1 %v6508_v14 }
 0x6d3   :  { %4836 = vmatprep.subr.bf16.mxu1 %v6513_v51 }
 0x6d6   :  { %4837 = vmatpush1.bf16.msra.mxu1 %v6511_v36 }
 0x6d9   :  { %4839 = vmatmul.mubr.bf16.vlgmr.msra.gmra.mrb[16].mxu1 %v6911_v41 }
 0x6ec   :  { %v4594_v4 = vpop.f32.mrb[12].mxu1 }
 0x6ed   :  { %v5505_v9 = vadd.f32 %v4594_v4, %v6871_v28  ;;  %v4596_v5 = vpop.f32.mrb[13].mxu1  ;;  %v4717_v48 = vpop.f32.mrb[8].mxu0  ;;  %v6534_v28 = vld [vmem:[#allocation2 + $0x8] sm:$0xff] }
 0x6ee   :  { %v5506_v10 = vadd.f32 %v4596_v5, %v6873_v30  ;;  %v4849_v3 = vmul.f32 0.2, %v4717_v48  ;;  %v4598_v24 = vpop.f32.mrb[14].mxu1  ;;  %v4719_v25 = vpop.f32.mrb[9].mxu0 }
 0x6ef   :  { %v4847_v26 = vmul.f32 0.2, %v5505_v9  ;;  %v4850_v31 = vmul.f32 0.2, %v4719_v25  ;;  %v4599_v32 = vpop.f32.mrb[15].mxu1  ;;  %v4721_v33 = vpop.f32.mrb[10].mxu0 }
 0x6f0   :  { %v4848_v34 = vmul.f32 0.2, %v5506_v10  ;;  %v4855_v35 = vadd.f32 %v6891_v6, %v4849_v3  ;;  %v4722_v39 = vpop.f32.mrb[11].mxu0 }
 0x6f1   :  { %v4853_v41 = vadd.f32 %v6875_v52, %v4847_v26  ;;  %v4856_v44 = vadd.f32 %v6881_v15, %v4850_v31 }
 0x6f2   :  { %v4854_v49 = vadd.f32 %v6534_v28, %v4848_v34  ;;  %4861 = vst [vmem:[#allocation8 + $0x10] sm:$0xff] %v4855_v35 }
 0x6f3   :  { %4859 = vst [vmem:[#allocation8] sm:$0xff] %v4853_v41  ;;  %4862 = vst [vmem:[#allocation8 + $0x18] sm:$0xff] %v4856_v44 }
 0x6f4   :  { %4860 = vst [vmem:[#allocation8 + $0x8] sm:$0xff] %v4854_v49 }
 0x7ac   :  { %v4840_v30 = vpop.f32.mrb[16].mxu1 }
 0x7ad   :  { %v4851_v53 = vmul.f32 0.2, %v4840_v30  ;;  %v4842_v54 = vpop.f32.mrb[17].mxu1 }
 0x7ae   :  { %v4852_v55 = vmul.f32 0.2, %v4842_v54  ;;  %v4844_v56 = vpop.f32.mrb[18].mxu1 }
 0x7af   :  { %v4857_v6 = vadd.f32 %v6907_v40, %v4851_v53  ;;  %v4845_v57 = vpop.f32.mrb[19].mxu1 }
 0x7b0   :  { %v4858_v52 = vadd.f32 %v6897_v27, %v4852_v55 }
 0x7b1   :  { %4863 = vst [vmem:[#allocation8 + $0x20] sm:$0xff] %v4857_v6 }
 0x7b2   :  { %4864 = vst [vmem:[#allocation8 + $0x28] sm:$0xff] %v4858_v52 }
 0x7b3   :  { %6612 = shalt.err (!%p6609_p0)
}
 0x7b4   :  { %s6613_s25 = scalar_lea.hbm %s6943_s3, 768 }
 0x7b5   :  { %p6614_p1 = scmp.ne.s32.totalorder %s6943_s3, %s6613_s25  ;;  %p6617_p2 = scmp.lt.u32.totalorder %s6613_s25, %s6943_s3 }
 0x7b7   :  { %p6619_p3 = pnand %p6617_p2, %p6614_p1 }
 0x7b9   :  { %6622 = shalt.err (!%p6619_p3)
}
 0x7ba   :  { %4874 = dma.vmem_to_hbm [thread:$0]  %s4872_s21, 768, %s6943_s3, [#allocation4]  }
 0x7bb   :  { %6627 = dma.done.wait [#allocation4], 768  }
 0x7bc   :  { %6628 = vsyncadd [#allocation4], 4294966528 }
 0x7bd   :  { %4878 = vsyncpa [#allocation3], 1 }
 0x7be   :  { %4879 = vsyncpa [#allocation6], 1 }
 0x7bf   :  { %4880 = vsyncpa [#allocation4], 1 }

</bundles_post_ra>
